<compile_context>
chip_gen: v5e
topology: v5e:2x2
jax: 0.10.0
libtpu: 0.0.40
codegen_flags: <defaults>
</compile_context>

<pallas_src>
import numpy as np
import jax
import jax.numpy as jnp
from jax.experimental import pallas as pl
from jax.experimental.pallas import tpu as pltpu


def _make_fused_kernel(N: int, H1: int, H2: int, H3: int):
    """Whole-network kernel, single invocation, batches stacked along M.

    Refs:
      x_ref   : (N*H1, 36)  bf16  conv1 im2col LHS, per-batch parity ordered
                                  (even pooled rows first, then odd).
      w1_ref  : (36, 64)    bf16  conv1 weight, height taps folded into K.
      w2_ref  : (192, 256)  bf16  conv2 weight, taps folded into K.
      sb1_ref : (2, 64)     f32   row 0 = BN1 scale, row 1 = BN1 bias.
      sb2_ref : (2, 256)    f32   row 0 = BN2 scale, row 1 = BN2 bias.
      w3_hbm  : (768, 512)  bf16  conv3 weight (taps folded), left in HBM.
      o_ref   : (N*H3, 512) f32   conv3 output (lane dense).
      w3_vmem : (768, 512)  bf16  VMEM landing buffer for the manual w3 DMA.
      w3_sem  :                   DMA completion semaphore.
    """
    n_odd = H1 - H2  # number of odd-parity pooled conv1 rows (H2 == ceil(H1/2))

    def kernel(x_ref, w1_ref, w2_ref, sb1_ref, sb2_ref, w3_hbm,
               o_ref, w3_vmem, w3_sem):
        # Kick off the conv3 weight DMA first so it overlaps conv1 + conv2.
        w3_copy = pltpu.make_async_copy(w3_hbm, w3_vmem, w3_sem)
        w3_copy.start()

        # ---- conv1 (+BN1+LeakyReLU): one bf16 MXU matmul over all batches,
        #      pool1-surviving rows only.
        a = jnp.dot(x_ref[...], w1_ref[...], preferred_element_type=jnp.float32)
        sb1 = sb1_ref[...]
        a = a * sb1[0:1, :] + sb1[1:2, :]
        a = jnp.where(a >= 0, a, jnp.float32(0.2) * a)          # (N*H1, 64) f32

        # ---- conv2 im2col: per batch, build the 3 stride-2 taps (contiguous
        #      thanks to parity ordering) and fold them into K (=192).
        #      conv2 has padding=(1,0); only pool2-surviving rows h = 2j are built,
        #      reading zero-padded conv1 pooled rows 2j-1, 2j, 2j+1.
        zrow = jnp.zeros((1, 64), jnp.float32)
        lhs2_parts = []
        for n in range(N):
            a_n = a[n * H1:(n + 1) * H1]
            a_even = a_n[:H2, :]                  # conv1 pooled rows 0,2,4,...
            a_odd = a_n[H2:, :]                   # conv1 pooled rows 1,3,5,...
            if n_odd < H2:                        # odd H1: bottom zero-pad row
                a_odd = jnp.concatenate([a_odd, zrow], axis=0)
            tap0 = jnp.concatenate([zrow, a_odd[:H2 - 1, :]], axis=0)
            lhs2_parts.append(jnp.concatenate([tap0, a_even, a_odd], axis=1))
        lhs2 = (jnp.concatenate(lhs2_parts, axis=0) if N > 1
                else lhs2_parts[0])               # (N*H2, 192)

        # ---- conv2 (+BN2+LeakyReLU): single K=192 bf16 matmul.
        b = jnp.dot(lhs2.astype(jnp.bfloat16), w2_ref[...],
                    preferred_element_type=jnp.float32)
        sb2 = sb2_ref[...]
        b = b * sb2[0:1, :] + sb2[1:2, :]
        b = jnp.where(b >= 0, b, jnp.float32(0.2) * b)          # (N*H2, 256)

        # ---- conv3 im2col (VALID): fold the 3 taps into K (=768).
        lhs3_parts = []
        for n in range(N):
            b_n = b[n * H2:(n + 1) * H2]
            lhs3_parts.append(jnp.concatenate(
                [b_n[0:H3, :], b_n[1:H3 + 1, :], b_n[2:H3 + 2, :]], axis=1))
        lhs3 = (jnp.concatenate(lhs3_parts, axis=0) if N > 1
                else lhs3_parts[0])               # (N*H3, 768)

        # ---- conv3: wait for the overlapped weight DMA, single K=768 matmul.
        w3_copy.wait()
        o = jnp.dot(lhs3.astype(jnp.bfloat16), w3_vmem[...],
                    preferred_element_type=jnp.float32)
        o_ref[...] = o.astype(o_ref.dtype)        # (N*H3, 512)

    return kernel


@jax.jit
def mfcc_encoder_alter_forward(x_nchw, p):
    # TODO(synk): nn.BatchNorm1d applied to a 4-D tensor raises in modern PyTorch
    # (and train-mode running-stat updates are stateful); BN is implemented here as
    # an inference-mode per-channel affine folded into the conv epilogues.
    N, _, H, W = x_nchw.shape                      # W == 12 (MFCC bins)
    H1 = (H - 2 - 1) // 3 + 1                      # conv1 rows surviving pool1 (stride 3)
    H2 = (H1 - 1) // 2 + 1                         # conv2 rows surviving pool2 (stride 2)
    H3 = H2 - 2                                    # conv3 VALID output rows
    if H3 < 1:
        raise ValueError(f"input height {H} too short: conv3 output would be empty")

    # conv1 has kernel height 3 and effective output stride 3 (pool1 keeps every 3rd
    # row), so its im2col LHS is a reshape of the first 3*H1 input rows.  Rows are
    # parity-reordered (even pooled rows first, then odd) so conv2's stride-2 taps
    # become contiguous static slices inside the kernel.  This is the only per-call
    # XLA glue on the input side (one small gather fusion, a few KB).
    perm = np.concatenate([np.arange(0, H1, 2), np.arange(1, H1, 2)])
    x_lhs = (x_nchw[:, 0, :3 * H1, :]
             .reshape(N, H1, 3 * W)[:, perm, :]
             .reshape(N * H1, 3 * W)
             .astype(jnp.bfloat16))

    out = pl.pallas_call(
        _make_fused_kernel(N, H1, H2, H3),
        out_shape=jax.ShapeDtypeStruct((N * H3, 512), jnp.float32),
        grid=(1,),
        in_specs=[
            pl.BlockSpec((N * H1, 3 * W), lambda i: (0, 0)),   # im2col LHS (bf16)
            pl.BlockSpec((3 * W, 64), lambda i: (0, 0)),       # w1, taps folded in K
            pl.BlockSpec((192, 256), lambda i: (0, 0)),        # w2, taps folded in K
            pl.BlockSpec((2, 64), lambda i: (0, 0)),           # BN1 scale/bias
            pl.BlockSpec((2, 256), lambda i: (0, 0)),          # BN2 scale/bias
            pl.BlockSpec(memory_space=pl.ANY),                 # w3 stays in HBM
        ],
        out_specs=pl.BlockSpec((N * H3, 512), lambda i: (0, 0)),
        scratch_shapes=[
            pltpu.VMEM((3 * 256, 512), jnp.bfloat16),          # w3 landing buffer
            pltpu.SemaphoreType.DMA,                           # its DMA semaphore
        ],
        compiler_params=pltpu.CompilerParams(
            dimension_semantics=("arbitrary",)),
    )(x_lhs, p["w1k"], p["w2k"], p["sb1"], p["sb2"], p["w3k"])

    # Kernel output is lane-dense (N*H3, 512); the tiny reshape/transpose to
    # PyTorch NCHW (N, 512, H3, 1) stays in XLA.
    return jnp.transpose(out.reshape(N, H3, 512), (0, 2, 1))[..., None]


def init_params(key):
    ks = jax.random.split(key, 11)
    p = {}
    # Conv weights as (kh, C_in, C_out), stored in bf16 (the kernel's MXU operand
    # dtype and half the HBM stream).  The reference upcasts the same bf16 values,
    # so both paths use identical parameters.
    w1 = (jax.random.normal(ks[0], (3, 12, 64), jnp.float32)
          / np.sqrt(3.0 * 12.0)).astype(jnp.bfloat16)
    w2 = (jax.random.normal(ks[1], (3, 64, 256), jnp.float32)
          / np.sqrt(3.0 * 64.0)).astype(jnp.bfloat16)
    w3 = (jax.random.normal(ks[2], (3, 256, 512), jnp.float32)
          / np.sqrt(3.0 * 256.0)).astype(jnp.bfloat16)
    p["w1"], p["w2"], p["w3"] = w1, w2, w3
    # Tap-folded (im2col) forms consumed by the kernel (computed once, not per call).
    p["w1k"] = w1.reshape(3 * 12, 64)
    p["w2k"] = w2.reshape(3 * 64, 256)
    p["w3k"] = w3.reshape(3 * 256, 512)

    def bn(kg, kb, km, kv, c):
        gamma = 1.0 + 0.1 * jax.random.normal(kg, (c,), jnp.float32)
        beta = 0.1 * jax.random.normal(kb, (c,), jnp.float32)
        mean = 0.1 * jax.random.normal(km, (c,), jnp.float32)
        var = jax.random.uniform(kv, (c,), jnp.float32, minval=0.5, maxval=1.5)
        scale = gamma / jnp.sqrt(var + 1e-5)
        bias = beta - mean * scale
        return jnp.stack([scale, bias], axis=0)      # (2, c): row0=scale, row1=bias

    p["sb1"] = bn(ks[3], ks[4], ks[5], ks[6], 64)
    p["sb2"] = bn(ks[7], ks[8], ks[9], ks[10], 256)
    return p


def reference_forward(x_nchw, p):
    """Pure-JAX NCHW reference mirroring the PyTorch graph (f32, HIGHEST precision)."""
    leaky = lambda t: jnp.where(t >= 0, t, 0.2 * t)
    dn = ("NCHW", "OIHW", "NCHW")
    hi = jax.lax.Precision.HIGHEST
    w1 = jnp.transpose(p["w1"].astype(jnp.float32), (2, 0, 1))[:, None, :, :]   # (64,1,3,12)
    net = jax.lax.conv_general_dilated(x_nchw, w1, (1, 1), "VALID",
                                       dimension_numbers=dn, precision=hi)
    net = net * p["sb1"][0].reshape(1, -1, 1, 1) + p["sb1"][1].reshape(1, -1, 1, 1)
    net = leaky(net)
    net = net[:, :, ::3, ::3]                                                    # MaxPool2d(1,3)
    w2 = jnp.transpose(p["w2"].astype(jnp.float32), (2, 1, 0))[:, :, :, None]    # (256,64,3,1)
    net = jax.lax.conv_general_dilated(net, w2, (1, 1), ((1, 1), (0, 0)),
                                       dimension_numbers=dn, precision=hi)
    net = net * p["sb2"][0].reshape(1, -1, 1, 1) + p["sb2"][1].reshape(1, -1, 1, 1)
    net = leaky(net)
    net = net[:, :, ::2, ::2]                                                    # MaxPool2d(1,2)
    w3 = jnp.transpose(p["w3"].astype(jnp.float32), (2, 1, 0))[:, :, :, None]    # (512,256,3,1)
    net = jax.lax.conv_general_dilated(net, w3, (1, 1), "VALID",
                                       dimension_numbers=dn, precision=hi)
    return net


if __name__ == "__main__":
    key = jax.random.PRNGKey(0)
    k_x, k_p = jax.random.split(key)
    # (N, C=1, T, n_mfcc=12): conv1's (3, 12) kernel consumes the full MFCC width.
    x = jax.random.normal(k_x, (2, 1, 32, 12), jnp.float32)
    params = init_params(k_p)

    out = mfcc_encoder_alter_forward(x, params)
    out = jax.block_until_ready(out)
    assert out.shape == (2, 512, 3, 1), out.shape

    ref = reference_forward(x, params)
    err = float(jnp.max(jnp.abs(out - ref)))
    # bf16 MXU operands with f32 accumulation vs the f32 HIGHEST-precision
    # reference: the rounding budget sits well inside this tolerance.
    assert err < 5e-2, f"max abs error vs reference: {err}"
    print("KERNEL_OK")
</pallas_src>

<mosaic_0001>
module attributes {stable_mosaic.version = 11 : i64} {
  func.func @kernel(%arg0: i32, %arg1: memref<20x36xbf16, #tpu.memory_space<vmem>>, %arg2: memref<36x64xbf16, #tpu.memory_space<vmem>>, %arg3: memref<192x256xbf16, #tpu.memory_space<vmem>>, %arg4: memref<2x64xf32, #tpu.memory_space<vmem>>, %arg5: memref<2x256xf32, #tpu.memory_space<vmem>>, %arg6: memref<768x512xbf16, #tpu.memory_space<any>>, %arg7: memref<6x512xf32, #tpu.memory_space<vmem>>, %arg8: memref<768x512xbf16, #tpu.memory_space<vmem>>, %arg9: memref<!tpu.dma_semaphore, #tpu.memory_space<semaphore_mem>>) attributes {dimension_semantics = [#tpu.dimension_semantics<arbitrary>], iteration_bounds = array<i64: 1>, scalar_prefetch = 0 : i64, scratch_operands = 2 : i64, tpu.core_type = #tpu.core_type<tc>, window_params = [{pipeline_mode = #tpu.pipeline_mode<synchronous>, transform_indices = @transform_0, window_bounds = array<i64: 20, 36>}, {pipeline_mode = #tpu.pipeline_mode<synchronous>, transform_indices = @transform_1, window_bounds = array<i64: 36, 64>}, {pipeline_mode = #tpu.pipeline_mode<synchronous>, transform_indices = @transform_2, window_bounds = array<i64: 192, 256>}, {pipeline_mode = #tpu.pipeline_mode<synchronous>, transform_indices = @transform_3, window_bounds = array<i64: 2, 64>}, {pipeline_mode = #tpu.pipeline_mode<synchronous>, transform_indices = @transform_4, window_bounds = array<i64: 2, 256>}, {}, {pipeline_mode = #tpu.pipeline_mode<synchronous>, transform_indices = @transform_6, window_bounds = array<i64: 6, 512>}]} {
    tpu.enqueue_dma source(%arg6 : memref<768x512xbf16, #tpu.memory_space<any>>) target(%arg8 : memref<768x512xbf16, #tpu.memory_space<vmem>>) target_semaphore(%arg9 : memref<!tpu.dma_semaphore, #tpu.memory_space<semaphore_mem>>)
    %c0 = arith.constant 0 : index
    %c0_0 = arith.constant 0 : index
    %0 = vector.load %arg1[%c0, %c0_0] : memref<20x36xbf16, #tpu.memory_space<vmem>>, vector<20x36xbf16>
    %c0_1 = arith.constant 0 : index
    %c0_2 = arith.constant 0 : index
    %1 = vector.load %arg2[%c0_1, %c0_2] : memref<36x64xbf16, #tpu.memory_space<vmem>>, vector<36x64xbf16>
    %cst = arith.constant dense<0.000000e+00> : vector<20x64xf32>
    %2 = tpu.matmul %0, %1, %cst {dimension_numbers = #tpu.dot_dimension_numbers<[1], [0], [0], [1], [0, 0, 1, 1], [], []>} : vector<20x36xbf16>, vector<36x64xbf16>, vector<20x64xf32> -> vector<20x64xf32>
    %c0_3 = arith.constant 0 : index
    %c0_4 = arith.constant 0 : index
    %3 = vector.load %arg4[%c0_3, %c0_4] : memref<2x64xf32, #tpu.memory_space<vmem>>, vector<2x64xf32>
    %4 = vector.extract_strided_slice %3 {offsets = [0, 0], sizes = [1, 64], strides = [1, 1]} : vector<2x64xf32> to vector<1x64xf32>
    %5 = vector.broadcast %4 : vector<1x64xf32> to vector<20x64xf32>
    %6 = arith.mulf %2, %5 : vector<20x64xf32>
    %7 = vector.extract_strided_slice %3 {offsets = [1, 0], sizes = [1, 64], strides = [1, 1]} : vector<2x64xf32> to vector<1x64xf32>
    %8 = vector.broadcast %7 : vector<1x64xf32> to vector<20x64xf32>
    %9 = arith.addf %6, %8 : vector<20x64xf32>
    %cst_5 = arith.constant 0.000000e+00 : f32
    %10 = vector.broadcast %cst_5 : f32 to vector<20x64xf32>
    %11 = arith.cmpf oge, %9, %10 : vector<20x64xf32>
    %cst_6 = arith.constant 2.000000e-01 : f32
    %12 = vector.broadcast %cst_6 : f32 to vector<20x64xf32>
    %13 = arith.mulf %12, %9 : vector<20x64xf32>
    %14 = arith.select %11, %9, %13 : vector<20x64xi1>, vector<20x64xf32>
    %cst_7 = arith.constant 0.000000e+00 : f32
    %15 = vector.broadcast %cst_7 : f32 to vector<1x64xf32>
    %16 = vector.extract_strided_slice %14 {offsets = [0, 0], sizes = [10, 64], strides = [1, 1]} : vector<20x64xf32> to vector<10x64xf32>
    %17 = vector.extract_strided_slice %16 {offsets = [0, 0], sizes = [5, 64], strides = [1, 1]} : vector<10x64xf32> to vector<5x64xf32>
    %18 = vector.extract_strided_slice %16 {offsets = [5, 0], sizes = [5, 64], strides = [1, 1]} : vector<10x64xf32> to vector<5x64xf32>
    %19 = vector.extract_strided_slice %18 {offsets = [0, 0], sizes = [4, 64], strides = [1, 1]} : vector<5x64xf32> to vector<4x64xf32>
    %20 = tpu.concatenate %15, %19 in 0 : vector<1x64xf32>, vector<4x64xf32> -> vector<5x64xf32>
    %21 = tpu.concatenate %20, %17, %18 in 1 : vector<5x64xf32>, vector<5x64xf32>, vector<5x64xf32> -> vector<5x192xf32>
    %22 = vector.extract_strided_slice %14 {offsets = [10, 0], sizes = [10, 64], strides = [1, 1]} : vector<20x64xf32> to vector<10x64xf32>
    %23 = vector.extract_strided_slice %22 {offsets = [0, 0], sizes = [5, 64], strides = [1, 1]} : vector<10x64xf32> to vector<5x64xf32>
    %24 = vector.extract_strided_slice %22 {offsets = [5, 0], sizes = [5, 64], strides = [1, 1]} : vector<10x64xf32> to vector<5x64xf32>
    %25 = vector.extract_strided_slice %24 {offsets = [0, 0], sizes = [4, 64], strides = [1, 1]} : vector<5x64xf32> to vector<4x64xf32>
    %26 = tpu.concatenate %15, %25 in 0 : vector<1x64xf32>, vector<4x64xf32> -> vector<5x64xf32>
    %27 = tpu.concatenate %26, %23, %24 in 1 : vector<5x64xf32>, vector<5x64xf32>, vector<5x64xf32> -> vector<5x192xf32>
    %28 = tpu.concatenate %21, %27 in 0 : vector<5x192xf32>, vector<5x192xf32> -> vector<10x192xf32>
    %29 = arith.truncf %28 : vector<10x192xf32> to vector<10x192xbf16>
    %c0_8 = arith.constant 0 : index
    %c0_9 = arith.constant 0 : index
    %30 = vector.load %arg3[%c0_8, %c0_9] : memref<192x256xbf16, #tpu.memory_space<vmem>>, vector<192x256xbf16>
    %cst_10 = arith.constant dense<0.000000e+00> : vector<10x256xf32>
    %31 = tpu.matmul %29, %30, %cst_10 {dimension_numbers = #tpu.dot_dimension_numbers<[1], [0], [0], [1], [0, 0, 1, 1], [], []>} : vector<10x192xbf16>, vector<192x256xbf16>, vector<10x256xf32> -> vector<10x256xf32>
    %c0_11 = arith.constant 0 : index
    %c0_12 = arith.constant 0 : index
    %32 = vector.load %arg5[%c0_11, %c0_12] : memref<2x256xf32, #tpu.memory_space<vmem>>, vector<2x256xf32>
    %33 = vector.extract_strided_slice %32 {offsets = [0, 0], sizes = [1, 256], strides = [1, 1]} : vector<2x256xf32> to vector<1x256xf32>
    %34 = vector.broadcast %33 : vector<1x256xf32> to vector<10x256xf32>
    %35 = arith.mulf %31, %34 : vector<10x256xf32>
    %36 = vector.extract_strided_slice %32 {offsets = [1, 0], sizes = [1, 256], strides = [1, 1]} : vector<2x256xf32> to vector<1x256xf32>
    %37 = vector.broadcast %36 : vector<1x256xf32> to vector<10x256xf32>
    %38 = arith.addf %35, %37 : vector<10x256xf32>
    %cst_13 = arith.constant 0.000000e+00 : f32
    %39 = vector.broadcast %cst_13 : f32 to vector<10x256xf32>
    %40 = arith.cmpf oge, %38, %39 : vector<10x256xf32>
    %cst_14 = arith.constant 2.000000e-01 : f32
    %41 = vector.broadcast %cst_14 : f32 to vector<10x256xf32>
    %42 = arith.mulf %41, %38 : vector<10x256xf32>
    %43 = arith.select %40, %38, %42 : vector<10x256xi1>, vector<10x256xf32>
    %44 = vector.extract_strided_slice %43 {offsets = [0, 0], sizes = [5, 256], strides = [1, 1]} : vector<10x256xf32> to vector<5x256xf32>
    %45 = vector.extract_strided_slice %44 {offsets = [0, 0], sizes = [3, 256], strides = [1, 1]} : vector<5x256xf32> to vector<3x256xf32>
    %46 = vector.extract_strided_slice %44 {offsets = [1, 0], sizes = [3, 256], strides = [1, 1]} : vector<5x256xf32> to vector<3x256xf32>
    %47 = vector.extract_strided_slice %44 {offsets = [2, 0], sizes = [3, 256], strides = [1, 1]} : vector<5x256xf32> to vector<3x256xf32>
    %48 = tpu.concatenate %45, %46, %47 in 1 : vector<3x256xf32>, vector<3x256xf32>, vector<3x256xf32> -> vector<3x768xf32>
    %49 = vector.extract_strided_slice %43 {offsets = [5, 0], sizes = [5, 256], strides = [1, 1]} : vector<10x256xf32> to vector<5x256xf32>
    %50 = vector.extract_strided_slice %49 {offsets = [0, 0], sizes = [3, 256], strides = [1, 1]} : vector<5x256xf32> to vector<3x256xf32>
    %51 = vector.extract_strided_slice %49 {offsets = [1, 0], sizes = [3, 256], strides = [1, 1]} : vector<5x256xf32> to vector<3x256xf32>
    %52 = vector.extract_strided_slice %49 {offsets = [2, 0], sizes = [3, 256], strides = [1, 1]} : vector<5x256xf32> to vector<3x256xf32>
    %53 = tpu.concatenate %50, %51, %52 in 1 : vector<3x256xf32>, vector<3x256xf32>, vector<3x256xf32> -> vector<3x768xf32>
    %54 = tpu.concatenate %48, %53 in 0 : vector<3x768xf32>, vector<3x768xf32> -> vector<6x768xf32>
    tpu.wait_dma2 semaphore(%arg9 : memref<!tpu.dma_semaphore, #tpu.memory_space<semaphore_mem>>) src(%arg6 : memref<768x512xbf16, #tpu.memory_space<any>>) dst(%arg8 : memref<768x512xbf16, #tpu.memory_space<vmem>>)
    %55 = arith.truncf %54 : vector<6x768xf32> to vector<6x768xbf16>
    %c0_15 = arith.constant 0 : index
    %c0_16 = arith.constant 0 : index
    %56 = vector.load %arg8[%c0_15, %c0_16] : memref<768x512xbf16, #tpu.memory_space<vmem>>, vector<768x512xbf16>
    %cst_17 = arith.constant dense<0.000000e+00> : vector<6x512xf32>
    %57 = tpu.matmul %55, %56, %cst_17 {dimension_numbers = #tpu.dot_dimension_numbers<[1], [0], [0], [1], [0, 0, 1, 1], [], []>} : vector<6x768xbf16>, vector<768x512xbf16>, vector<6x512xf32> -> vector<6x512xf32>
    %c0_18 = arith.constant 0 : index
    %c0_19 = arith.constant 0 : index
    %58 = vector.load %arg7[%c0_18, %c0_19] : memref<6x512xf32, #tpu.memory_space<vmem>>, vector<6x512xf32>
    tpu.vector_store %arg7[%c0_18, %c0_19], %57 {strides = array<i32>} : memref<6x512xf32, #tpu.memory_space<vmem>>, vector<6x512xf32>,
    return
  }
  func.func @transform_0(%arg0: i32) -> (i32, i32) {
    %c0_i32 = arith.constant 0 : i32
    %c0_i32_0 = arith.constant 0 : i32
    %c0_i32_1 = arith.constant 0 : i32
    return %c0_i32, %c0_i32_0 : i32, i32
  }
  func.func @transform_1(%arg0: i32) -> (i32, i32) {
    %c0_i32 = arith.constant 0 : i32
    %c0_i32_0 = arith.constant 0 : i32
    %c0_i32_1 = arith.constant 0 : i32
    return %c0_i32, %c0_i32_0 : i32, i32
  }
  func.func @transform_2(%arg0: i32) -> (i32, i32) {
    %c0_i32 = arith.constant 0 : i32
    %c0_i32_0 = arith.constant 0 : i32
    %c0_i32_1 = arith.constant 0 : i32
    return %c0_i32, %c0_i32_0 : i32, i32
  }
  func.func @transform_3(%arg0: i32) -> (i32, i32) {
    %c0_i32 = arith.constant 0 : i32
    %c0_i32_0 = arith.constant 0 : i32
    %c0_i32_1 = arith.constant 0 : i32
    return %c0_i32, %c0_i32_0 : i32, i32
  }
  func.func @transform_4(%arg0: i32) -> (i32, i32) {
    %c0_i32 = arith.constant 0 : i32
    %c0_i32_0 = arith.constant 0 : i32
    %c0_i32_1 = arith.constant 0 : i32
    return %c0_i32, %c0_i32_0 : i32, i32
  }
  func.func @transform_6(%arg0: i32) -> (i32, i32) {
    %c0_i32 = arith.constant 0 : i32
    %c0_i32_0 = arith.constant 0 : i32
    %c0_i32_1 = arith.constant 0 : i32
    return %c0_i32, %c0_i32_0 : i32, i32
  }
}

</mosaic_0001>

<bundles_post_ra>
// kernel: squeeze.1
= control target key start
LH: loop header
LB: loop body
LE: loop exit
PB: predicated region body
PF: predicated region fallthrough
CT: control target
= control target key end

     0   :  { %vm152_vm0 = vcmask 1047557   ;;  %vm123_vm1 = vcmask 97280   ;;  %s274_s14 = smov 24   ;;  %s275_s15 = smov 12   ;;  %vm146_vm2 = vcmask 294080   ;;  %vm172_vm3 = vcmask 195680   ;;  %s312_s0 = inlined_call_operand.vmem [shape: bf16[2,1,30,12], index: 0, kind: input, shape index: {}]   ;;  %s313_s1 = inlined_call_operand.vmem [shape: bf16[2,10,36], index: 1, kind: output, shape index: {}]  }
   0x1   :  { %v258_v0 = vld [vmem:[%s312_s0 + $0x18] sm:$0xff]   ;;  %v259_v1 = vld [vmem:[%s312_s0 + $0x10] sm:$0xff]   ;;  %v260_v2 = vld [vmem:[%s312_s0 + $0x8] sm:$0xff]   ;;  %s137_s16 = smov 3 }
   0x2   :  { %v234_v3 = vunpack.c.l.bf16 %v258_v0  ;;  %v238_v4 = vunpack.c.l.bf16 %v259_v1  ;;  %v239_v5 = vunpack.c.h.bf16 %v259_v1  ;;  %v245_v6 = vld [vmem:[%s312_s0] sm:$0xff]   ;;  %v243_v7 = vunpack.c.h.bf16 %v260_v2  ;;  %s126_s0 = smov 3 }
   0x3   :  { %v242_v8 = vunpack.c.l.bf16 %v260_v2  ;;  %v247_v9 = vunpack.c.h.bf16 %v245_v6  ;;  %v246_v10 = vunpack.c.l.bf16 %v245_v6  ;;  %v235_v11 = vunpack.c.h.bf16 %v258_v0 }
   0x4   :  { %33 = vst [vmem:[#allocation1 + $0x30] sm:$0xff] %v234_v3 }
   0x5   :  { %48 = vst [vmem:[#allocation1 + $0x28] sm:$0xff] %v239_v5 }
   0x6   :  { %63 = vst [vmem:[#allocation1 + $0x20] sm:$0xff] %v238_v4 }
   0x7   :  { %78 = vst [vmem:[#allocation1 + $0x18] sm:$0xff] %v243_v7 }
   0x8   :  { %93 = vst [vmem:[#allocation1 + $0x10] sm:$0xff] %v242_v8 }
   0x9   :  { %108 = vst [vmem:[#allocation1 + $0x8] sm:$0xff] %v247_v9 }
   0xa   :  { %121 = vst [vmem:[#allocation1] sm:$0xff] %v246_v10 }
   0xb   :  { %18 = vst [vmem:[#allocation1 + $0x38] sm:$0xff] %v235_v11 }
   0xc   :  { %v151_v12 = vld [vmem:[#allocation1 + $0x1c] ss:$3 sm:$0xe0]   ;;  %v177_v13 = vld [vmem:[#allocation1 + $0x1b] ss:$3 sm:$0xe0]  }
   0xd   :  { %v132_v26 = vld [vmem:[#allocation1 + $0x20] ss:$3 sm:$0xff]  }
   0xe   :  { %v149_v14 = vld.sshfl [vmem:[#allocation1 + $0x1a] sm:$0xff pattern:$0xeeeeb830]   ;;  %v175_v15 = vld.sshfl [vmem:[#allocation1 + $0x19] sm:$0xff pattern:$0xeeeeb830]  }
   0xf   :  { %v153_v16 = vsel %vm152_vm0, %v151_v12, %v149_v14  ;;  %v179_v17 = vsel %vm152_vm0, %v177_v13, %v175_v15  ;;  %v127_v18 = vld [vmem:[#allocation1 + $0x18] ss:$3 sm:%s126_s0]   ;;  %135 = vst.msk [vmem:[#allocation0 + $0x10] sm:$0xff] %vm123_vm1, %v132_v26  }
  0x10   :  { %130 = vst.msk [vmem:[#allocation0 + $0x8] sm:$0x3] %vm123_vm1, %v127_v18  }
  0x11   :  { %v143_v19 = vld [vmem:[#allocation1 + $0x2] ss:$3 sm:$0xff]   ;;  %v169_v20 = vld [vmem:[#allocation1 + $0x1] ss:$3 sm:$0xff]   ;;  %v122_v21 = vld [vmem:[#allocation1] ss:$3 sm:$0xff]  }
  0x12   :  { %v264_v22 = vpack.i.bf16 %v153_v16, %v143_v19  ;;  %v269_v23 = vpack.i.bf16 %v179_v17, %v169_v20  ;;  %124 = vst.msk [vmem:[#allocation0] sm:$0xff] %vm123_vm1, %v122_v21   ;;  %v162_v24 = vld [vmem:[#allocation1 + $0x34] ss:$3 sm:$0xf]   ;;  %v138_v27 = vld [vmem:[#allocation1 + $0x38] ss:$3 sm:%s137_s16]  }
  0x13   :  { %v188_v25 = vld [vmem:[#allocation1 + $0x33] ss:$3 sm:$0xf]   ;;  %141 = vst.msk [vmem:[#allocation0 + $0x18] sm:$0x3] %vm123_vm1, %v138_v27  }
  0x14   :  { %265 = vrot.lane.b32.xlu0 %v264_v22, %s274_s14  ;;  %270 = vrot.lane.b32.xlu1 %v269_v23, %s275_s15 }
  0x1c   :  { %163 = vrot.lane.b32.xlu0 %v162_v24, %s274_s14  ;;  %189 = vrot.lane.b32.xlu1 %v188_v25, %s275_s15 }
  0x86   :  { %v266_v28 = vpop.permute.xlu0 %265  ;;  %v271_v29 = vpop.permute.xlu1 %270 }
  0x87   :  { %v268_v30 = vunpack.i.h.bf16 %v266_v28  ;;  %v267_v31 = vunpack.i.l.bf16 %v266_v28  ;;  %v272_v32 = vunpack.i.l.bf16 %v271_v29  ;;  %v273_v33 = vunpack.i.h.bf16 %v271_v29 }
  0x89   :  { %158 = vst.msk [vmem:[#allocation0 + $0x8] sm:$0x3] %vm146_vm2, %v268_v30  }
  0x8a   :  { %147 = vst.msk [vmem:[#allocation0] sm:$0xff] %vm146_vm2, %v267_v31  }
  0x8b   :  { %160 = vst.msk [vmem:[#allocation0 + $0xe] sm:$0xfc] %vm146_vm2, %v268_v30  }
  0x8c   :  { %173 = vst.msk [vmem:[#allocation0] sm:$0xff] %vm172_vm3, %v272_v32  }
  0x8d   :  { %184 = vst.msk [vmem:[#allocation0 + $0x8] sm:$0x3] %vm172_vm3, %v273_v33  }
  0x8e   :  { %186 = vst.msk [vmem:[#allocation0 + $0xe] sm:$0xfc] %vm172_vm3, %v273_v33   ;;  %v164_v34 = vpop.permute.xlu0 %163   ;;  %v190_v35 = vpop.permute.xlu1 %189  }
  0x8f   :  { %167 = vst.msk [vmem:[#allocation0 + $0x16] sm:$0xf] %vm146_vm2, %v164_v34  }
  0x90   :  { %193 = vst.msk [vmem:[#allocation0 + $0x16] sm:$0xf] %vm172_vm3, %v190_v35  }
  0x93   :  { %v196_v36 = vld [vmem:[#allocation0] sm:$0xff] }
  0x94   :  { %v202_v37 = vld [vmem:[#allocation0 + $0x8] sm:$0xff] }
  0x95   :  { %v251_v38 = vpack.c.bf16 %v202_v37, %v196_v36 }
  0x97   :  { %252 = vst [vmem:[%s313_s1] sm:$0xff] %v251_v38   ;;  %v209_v39 = vld [vmem:[#allocation0 + $0x10] sm:$0xff]  ;;  %v216_v40 = vld [vmem:[#allocation0 + $0x18] sm:$0xff] }
  0x98   :  { %v256_v41 = vpack.c.bf16 %v216_v40, %v209_v39 }
  0x9a   :  { %261 = vst [vmem:[%s313_s1 + $0x8] sm:$0xff] %v256_v41  }

// kernel: mfcc_encoder_alter_forward.1
= control target key start
LH: loop header
LB: loop body
LE: loop exit
PB: predicated region body
PF: predicated region fallthrough
CT: control target
= control target key end

     0   :  { %vm73_vm0 = vcmask 1041408   ;;  %vm66_vm1 = vcmask 293888   ;;  %vm115_vm4 = vcmask 1043456   ;;  %vm120_vm5 = vcmask 1040384   ;;  %s3050_s28 = smov 64   ;;  %s3051_s25 = smov [#allocation2]   ;;  %s3359_s1 = inlined_call_operand.vmem [shape: bf16[36,64], index: 1, kind: input, shape index: {}]   ;;  %s3360_s0 = inlined_call_operand.vmem [shape: bf16[20,36], index: 0, kind: input, shape index: {}]   ;;  %s3361_s2 = inlined_call_operand.vmem [shape: bf16[192,256], index: 2, kind: input, shape index: {}]   ;;  %s3362_s3 = inlined_call_operand.vmem [shape: f32[2,64], index: 3, kind: input, shape index: {}]   ;;  %s3363_s5 = inlined_call_operand.hbm [shape: bf16[768,512], index: 5, kind: input, shape index: {}]   ;;  %s3364_s6 = inlined_call_operand.vmem [shape: f32[6,512], index: 6, kind: output, shape index: {}]   ;;  %s3365_s4 = inlined_call_operand.vmem [shape: f32[2,256], index: 4, kind: input, shape index: {}]  }
   0x1   :  { %v42_v0 = vld [vmem:[%s3359_s1 + $0x10] sm:$0x3]  ;;  %v2800_v4 = vld [vmem:[%s3359_s1 + $0x8] sm:$0xff]  ;;  %v2799_v5 = vld [vmem:[%s3359_s1] sm:$0xff]  ;;  %vm125_vm7 = vcmask 1042432   ;;  %vm151_vm8 = vcmask 1044480  }
   0x2   :  { %v60_v1 = vunpack.c.l.b16 %v42_v0  ;;  %v2798_v6 = vld [vmem:[%s3360_s0] sm:$0xff]  ;;  %v37_v7 = vld [vmem:[%s3360_s0 + $0x8] sm:$0x3]  ;;  %v2021_v10 = vld [vmem:[%s3361_s2 + $0xb0] sm:$0xf]  ;;  %vm130_vm9 = vcmask 523264  }
   0x3   :  { %v48_v8 = vunpack.c.l.b16 %v37_v7  ;;  %v2824_v11 = vld [vmem:[%s3361_s2 + $0xb4] sm:$0xf0]  ;;  %v2013_v13 = vld [vmem:[%s3361_s2 + $0xa0] sm:$0xf]  ;;  %v2822_v14 = vld [vmem:[%s3361_s2 + $0xa4] sm:$0xf0] }
   0x4   :  { %v63_v2 = vpack.c.b16 %v60_v1, %v60_v1  ;;  %v2022_v12 = vor.u32 %v2824_v11, %v2021_v10  ;;  %v2014_v15 = vor.u32 %v2822_v14, %v2013_v13  ;;  %v2005_v16 = vld [vmem:[%s3361_s2 + $0x90] sm:$0xf]  ;;  %v2820_v17 = vld [vmem:[%s3361_s2 + $0x94] sm:$0xf0]  ;;  %v1997_v19 = vld [vmem:[%s3361_s2 + $0x80] sm:$0xf] }
   0x5   :  { %v50_v9 = vpack.c.b16 %v48_v8, %v48_v8  ;;  %v2006_v18 = vor.u32 %v2820_v17, %v2005_v16  ;;  %v2818_v20 = vld [vmem:[%s3361_s2 + $0x84] sm:$0xf0]  ;;  %v95_v22 = vld [vmem:[%s3362_s3] sm:$0x3]  ;;  %v2823_v24 = vld [vmem:[%s3361_s2 + $0xb4] sm:$0xf] }
   0x6   :  { %v75_v3 = vsel %vm73_vm0, %v63_v2, 0  ;;  %321 = vmatpush.bf16.msra.mxu2 %v2022_v12  ;;  %v1998_v21 = vor.u32 %v2818_v20, %v1997_v19  ;;  %v96_v23 = vperm.slane %v95_v22, 0  ;;  %v2023_v25 = vld [vmem:[%s3361_s2 + $0xb8] sm:$0xf0]  ;;  %v2821_v28 = vld [vmem:[%s3361_s2 + $0xa4] sm:$0xf] }
   0x7   :  { %82 = vmatpush.bf16.msra.mxu0 %v75_v3  ;;  %v2026_v26 = vor.u32 %v2823_v24, %v2023_v25  ;;  %v2015_v29 = vld [vmem:[%s3361_s2 + $0xa8] sm:$0xf0]  ;;  %v100_v31 = vperm.slane %v95_v22, 1  ;;  %v2819_v33 = vld [vmem:[%s3361_s2 + $0x94] sm:$0xf]  ;;  %s29_s24 = sshll.u32 %s3363_s5, 4  ;;  %s30_s24 = int_to_ptr.hbm [resolvable:$true] %s29_s24 }
   0x8   :  { %v2018_v32 = vor.u32 %v2821_v28, %v2015_v29  ;;  %v2007_v34 = vld [vmem:[%s3361_s2 + $0x98] sm:$0xf0]  ;;  %v2817_v37 = vld [vmem:[%s3361_s2 + $0x84] sm:$0xf]  ;;  %v1999_v38 = vld [vmem:[%s3361_s2 + $0x88] sm:$0xf0] }
   0x9   :  { %v2010_v36 = vor.u32 %v2819_v33, %v2007_v34  ;;  %v2002_v42 = vor.u32 %v2817_v37, %v1999_v38  ;;  %v1989_v50 = vld [vmem:[%s3361_s2 + $0x70] sm:$0xf]  ;;  %v2816_v53 = vld [vmem:[%s3361_s2 + $0x74] sm:$0xf0]  ;;  %v2815_v54 = vld [vmem:[%s3361_s2 + $0x74] sm:$0xf] }
   0xa   :  { %322 = vmatpush.bf16.msra.mxu2 %v2014_v15  ;;  %v1991_v55 = vld [vmem:[%s3361_s2 + $0x78] sm:$0xf0]  ;;  %v1990_v57 = vor.u32 %v2816_v53, %v1989_v50  ;;  %v1981_v59 = vld [vmem:[%s3361_s2 + $0x60] sm:$0xf]  ;;  %v2814_v60 = vld [vmem:[%s3361_s2 + $0x64] sm:$0xf0] }
   0xb   :  { %83 = vmatpush.bf16.msra.mxu0 %v2800_v4  ;;  %v1994_v58 = vor.u32 %v2815_v54, %v1991_v55  ;;  %v2813_v61 = vld [vmem:[%s3361_s2 + $0x64] sm:$0xf]  ;;  %v1983_v63 = vld [vmem:[%s3361_s2 + $0x68] sm:$0xf0]  ;;  %v1982_v1 = vor.u32 %v2814_v60, %v1981_v59  ;;  %v1973_v2 = vld [vmem:[%s3361_s2 + $0x50] sm:$0xf] }
   0xc   :  { %303 = vmatpush.bf16.msra.mxu1 %v1990_v57  ;;  %v1986_v4 = vor.u32 %v2813_v61, %v1983_v63  ;;  %v2811_v7 = vld [vmem:[%s3361_s2 + $0x54] sm:$0xf]  ;;  %v1975_v8 = vld [vmem:[%s3361_s2 + $0x58] sm:$0xf0]  ;;  %v1965_v17 = vld [vmem:[%s3361_s2 + $0x40] sm:$0xf] }
   0xd   :  { %331 = vmatpush.bf16.msra.mxu3 %v1994_v58  ;;  %v1978_v16 = vor.u32 %v2811_v7, %v1975_v8  ;;  %v2809_v22 = vld [vmem:[%s3361_s2 + $0x44] sm:$0xf]  ;;  %v2807_v34 = vld [vmem:[%s3361_s2 + $0x34] sm:$0xf]  ;;  %v1949_v38 = vld [vmem:[%s3361_s2 + $0x20] sm:$0xf] }
   0xe   :  { %323 = vmatpush.bf16.msra.mxu2 %v2006_v18  ;;  %v2810_v18 = vld [vmem:[%s3361_s2 + $0x44] sm:$0xf0]  ;;  %v1933_v50 = vld [vmem:[%s3361_s2] sm:$0xf]  ;;  %v1935_v54 = vld [vmem:[%s3361_s2 + $0x8] sm:$0xf0] }
   0xf   :  { %84 = vmatpush.bf16.msra.mxu0 %v2799_v5  ;;  %v2812_v5 = vld [vmem:[%s3361_s2 + $0x54] sm:$0xf0]  ;;  %s31_s26 = sshll.u32 %s3051_s25, 4  ;;  %vm405_vm13 = vcmask 1046528   ;;  %vm410_vm14 = vcmask 1045504   ;;  %s32_s26 = int_to_ptr.vmem [resolvable:$true] %s31_s26 }
  0x10   :  { %304 = vmatpush.bf16.msra.mxu1 %v1982_v1  ;;  %v1974_v15 = vor.u32 %v2812_v5, %v1973_v2  ;;  %34 = dma.hbm_to_vmem [thread:$0]  %s30_s24, 24576, %s32_s26, [#allocation3]  ;;  %v359_v1 = vld [vmem:[%s3365_s4] sm:$0xf] }
  0x11   :  { %332 = vmatpush.bf16.msra.mxu3 %v1986_v4  ;;  %v371_v4 = vperm.slane %v359_v1, 1 }
  0x12   :  { %1929 = vmatmul.msk.bf16.vlgmr.msra.gmra.mxu0 %vm66_vm1, %v2798_v6  ;;  %324 = vmatpush.bf16.msra.mxu2 %v1998_v21 }
  0x13   :  { %v375_v8 = vperm.slane %v371_v4, 1 }
  0x14   :  { %305 = vmatpush.bf16.msra.mxu1 %v1974_v15 }
  0x15   :  { %333 = vmatpush.bf16.msra.mxu3 %v1978_v16 }
  0x16   :  { %349 = vmatpush.bf16.msrb.mxu2 %v2026_v26 }
  0x1a   :  { %350 = vmatpush.bf16.msrb.mxu2 %v2018_v32  ;;  %v2808_v32 = vld [vmem:[%s3361_s2 + $0x34] sm:$0xf0] }
  0x1e   :  { %351 = vmatpush.bf16.msrb.mxu2 %v2010_v36 }
  0x22   :  { %1930 = vmatmul.msk.bf16.gmra.mxu0 %vm66_vm1, %v50_v9  ;;  %352 = vmatpush.bf16.msrb.mxu2 %v2002_v42 }
  0x8f   :  { %v86_v27 = vpop.f32.mrf.mxu0 }
  0x90   :  { %v97_v30 = vmul.f32 %v96_v23, %v86_v27  ;;  %v1966_v27 = vor.u32 %v2810_v18, %v1965_v17 }
  0x92   :  { %v101_v35 = vadd.f32 %v100_v31, %v97_v30  ;;  %306 = vmatpush.bf16.msra.mxu1 %v1966_v27 }
  0x94   :  { %v107_v40 = vmul.f32 0.2, %v101_v35  ;;  %vm104_vm2 = vcmp.ge.f32.partialorder %v101_v35, 0.0 }
  0x96   :  { %v110_v45 = vsel %vm104_vm2, %v101_v35, %v107_v40  ;;  %v1959_v35 = vld [vmem:[%s3361_s2 + $0x38] sm:$0xf0]  ;;  %v2805_v40 = vld [vmem:[%s3361_s2 + $0x24] sm:$0xf] }
  0x97   :  { %v88_v39 = vpop.f32.mrf.mxu0  ;;  %v116_v48 = vrot.slane %v110_v45, 4  ;;  %v126_v20 = vrot.slane %v110_v45, 5  ;;  %v1962_v37 = vor.u32 %v2807_v34, %v1959_v35 }
  0x98   :  { %v98_v41 = vmul.f32 %v96_v23, %v88_v39  ;;  %v2806_v39 = vld [vmem:[%s3361_s2 + $0x24] sm:$0xf0] }
  0x99   :  { %v1950_v42 = vor.u32 %v2806_v39, %v1949_v38 }
  0x9a   :  { %v102_v43 = vadd.f32 %v100_v31, %v98_v41  ;;  %v1951_v41 = vld [vmem:[%s3361_s2 + $0x28] sm:$0xf0] }
  0x9c   :  { %vm105_vm3 = vcmp.ge.f32.partialorder %v102_v43, 0.0  ;;  %v108_v44 = vmul.f32 0.2, %v102_v43 }
  0x9e   :  { %v111_v46 = vsel %vm105_vm3, %v102_v43, %v108_v44  ;;  %v1954_v43 = vor.u32 %v2805_v40, %v1951_v41  ;;  %v1941_v44 = vld [vmem:[%s3361_s2 + $0x10] sm:$0xf] }
  0x9f   :  { %v91_v47 = vpop.f32.mrf.mxu0  ;;  %v138_v49 = vrot.slane %v111_v46, 2  ;;  %v117_v51 = vrot.slane %v111_v46, 4  ;;  %v127_v10 = vrot.slane %v111_v46, 5  ;;  %v142_v13 = vrot.slane %v111_v46, 7 }
  0xa0   :  { %v99_v52 = vmul.f32 %v96_v23, %v91_v47  ;;  %v133_v19 = vrot.slane %v111_v46, 6  ;;  %v1967_v23 = vld [vmem:[%s3361_s2 + $0x48] sm:$0xf0]  ;;  %v2803_v46 = vld [vmem:[%s3361_s2 + $0x14] sm:$0xf] }
  0xa1   :  { %v3019_v56 = vpack.i.bf16 %v110_v45, %v138_v49  ;;  %v118_v0 = vsel %vm115_vm4, %v116_v48, %v117_v51  ;;  %v128_v26 = vsel %vm125_vm7, %v126_v20, %v127_v10  ;;  %v1970_v30 = vor.u32 %v2809_v22, %v1967_v23  ;;  %v2804_v45 = vld [vmem:[%s3361_s2 + $0x14] sm:$0xf0]  ;;  %v1943_v48 = vld [vmem:[%s3361_s2 + $0x18] sm:$0xf0]  ;;  %v2802_v51 = vld [vmem:[%s3361_s2 + $0x4] sm:$0xf0] }
  0xa2   :  { %v103_v62 = vadd.f32 %v100_v31, %v99_v52  ;;  %v3186_v6 = vsel %vm120_vm5, 0.0, %v118_v0  ;;  %v1957_v31 = vld [vmem:[%s3361_s2 + $0x30] sm:$0xf]  ;;  %v1942_v47 = vor.u32 %v2804_v45, %v1941_v44  ;;  %v1946_v49 = vor.u32 %v2803_v46, %v1943_v48  ;;  %v2801_v52 = vld [vmem:[%s3361_s2 + $0x4] sm:$0xf] }
  0xa3   :  { %3020 = vrot.lane.b32.xlu0 %v3019_v56, %s3050_s28  ;;  %v1958_v36 = vor.u32 %v2808_v32, %v1957_v31  ;;  %334 = vmatpush.bf16.msra.mxu3 %v1970_v30  ;;  %v1934_v53 = vor.u32 %v2802_v51, %v1933_v50  ;;  %v1938_v55 = vor.u32 %v2801_v52, %v1935_v54 }
  0xa4   :  { %vm106_vm6 = vcmp.ge.f32.partialorder %v103_v62, 0.0  ;;  %v109_v3 = vmul.f32 0.2, %v103_v62 }
  0xa5   :  { %307 = vmatpush.bf16.msra.mxu1 %v1958_v36 }
  0xa6   :  { %v112_v9 = vsel %vm106_vm6, %v103_v62, %v109_v3  ;;  %v361_v3 = vperm.slane %v359_v1, 0 }
  0xa7   :  { %v134_v11 = vrot.slane %v112_v9, 6  ;;  %v143_v12 = vrot.slane %v112_v9, 7  ;;  %v93_v14 = vpop.f32.mrf.mxu0  ;;  %335 = vmatpush.bf16.msra.mxu3 %v1962_v37  ;;  %v362_v9 = vperm.slane %v359_v1, 2 }
  0xa8   :  { %v365_v5 = vperm.slane %v361_v3, 0 }
  0xa9   :  { %v144_v21 = vsel %vm120_vm5, %v142_v13, %v143_v12  ;;  %v135_v25 = vsel %vm73_vm0, %v133_v19, %v134_v11  ;;  %308 = vmatpush.bf16.msra.mxu1 %v1950_v42  ;;  %v372_v11 = vperm.slane %v359_v1, 3  ;;  %v366_v14 = vperm.slane %v362_v9, 0 }
  0xaa   :  { %v148_v24 = vrot.slane %v144_v21, 3  ;;  %v137_v28 = vsel %vm120_vm5, 0.0, %v135_v25 }
  0xab   :  { %336 = vmatpush.bf16.msra.mxu3 %v1954_v43  ;;  %v376_v18 = vperm.slane %v372_v11, 1 }
  0xac   :  { %v153_v29 = vsel %vm151_vm8, %v128_v26, %v148_v24 }
  0xad   :  { %v155_v33 = vpack.c.bf16 %v148_v24, %v153_v29  ;;  %309 = vmatpush.bf16.msra.mxu1 %v1942_v47 }
  0xaf   :  { %2027 = vmatmul.msk.bf16.vlgmr.msra.gmra.mxu2 %vm130_vm9, %v155_v33  ;;  %337 = vmatpush.bf16.msra.mxu3 %v1946_v49 }
  0xb1   :  { %310 = vmatpush.bf16.msra.mxu1 %v1934_v53 }
  0xb3   :  { %338 = vmatpush.bf16.msra.mxu3 %v1938_v55 }
  0xbf   :  { %2028 = vmatmul.msk.bf16.vlgmr.msrb.gmra.mxu2 %vm130_vm9, %v155_v33 }
 0x115   :  { %v3021_v56 = vpop.permute.xlu0 %3020 }
 0x116   :  { %v3023_v57 = vunpack.i.h.bf16 %v3021_v56  ;;  %v3022_v58 = vunpack.i.l.bf16 %v3021_v56 }
 0x118   :  { %v145_v59 = vsel %vm130_vm9, %v137_v28, %v3022_v58  ;;  %v131_v61 = vsel %vm130_vm9, %v3186_v6, %v3023_v57 }
 0x119   :  { %v147_v60 = vrot.slane %v145_v59, 3 }
 0x11b   :  { %v152_v62 = vsel %vm151_vm8, %v131_v61, %v147_v60 }
 0x11c   :  { %v154_v63 = vpack.c.bf16 %v147_v60, %v152_v62 }
 0x11e   :  { %311 = vmatmul.bf16.vlgmr.msra.gmra.mxu1 %v154_v63  ;;  %339 = vmatmul.bf16.vlgmr.msra.gmra.mxu3 %v154_v63 }
 0x132   :  { %v326_v0 = vpop.f32.mrf.mxu2 }
 0x13a   :  { %v328_v2 = vpop.f32.mrf.mxu2 }
 0x142   :  { %v354_v12 = vpop.f32.mrf.mxu2 }
 0x14a   :  { %v356_v29 = vpop.f32.mrf.mxu2 }
 0x19b   :  { %v312_v6 = vpop.f32.mrf.mxu1 }
 0x19c   :  { %v327_v7 = vadd.f32 %v326_v0, %v312_v6 }
 0x19e   :  { %v367_v10 = vmul.f32 %v365_v5, %v327_v7 }
 0x1a0   :  { %v377_v13 = vadd.f32 %v375_v8, %v367_v10 }
 0x1a1   :  { %v340_v15 = vpop.f32.mrf.mxu3 }
 0x1a2   :  { %vm381_vm10 = vcmp.ge.f32.partialorder %v377_v13, 0.0  ;;  %v385_v16 = vmul.f32 0.2, %v377_v13  ;;  %v355_v17 = vadd.f32 %v354_v12, %v340_v15 }
 0x1a3   :  { %v314_v19 = vpop.f32.mrf.mxu1 }
 0x1a4   :  { %v389_v20 = vsel %vm381_vm10, %v377_v13, %v385_v16  ;;  %v368_v21 = vmul.f32 %v366_v14, %v355_v17  ;;  %v329_v22 = vadd.f32 %v328_v2, %v314_v19 }
 0x1a5   :  { %v399_v23 = vrot.slane %v389_v20, 2  ;;  %v395_v37 = vrot.slane %v389_v20, 1 }
 0x1a6   :  { %v378_v24 = vadd.f32 %v376_v18, %v368_v21  ;;  %v369_v25 = vmul.f32 %v365_v5, %v329_v22 }
 0x1a7   :  { %v3272_v26 = vsel %vm125_vm7, %v389_v20, %v399_v23 }
 0x1a8   :  { %vm382_vm11 = vcmp.ge.f32.partialorder %v378_v24, 0.0  ;;  %v386_v27 = vmul.f32 0.2, %v378_v24  ;;  %v379_v28 = vadd.f32 %v375_v8, %v369_v25 }
 0x1a9   :  { %v342_v30 = vpop.f32.mrf.mxu3 }
 0x1aa   :  { %v390_v31 = vsel %vm382_vm11, %v378_v24, %v386_v27  ;;  %vm383_vm12 = vcmp.ge.f32.partialorder %v379_v28, 0.0  ;;  %v387_v32 = vmul.f32 0.2, %v379_v28  ;;  %v357_v33 = vadd.f32 %v356_v29, %v342_v30 }
 0x1ab   :  { %v400_v34 = vrot.slane %v390_v31, 2  ;;  %v396_v50 = vrot.slane %v390_v31, 1 }
 0x1ac   :  { %v391_v35 = vsel %vm383_vm12, %v379_v28, %v387_v32  ;;  %v370_v36 = vmul.f32 %v366_v14, %v357_v33 }
 0x1ad   :  { %v3275_v38 = vsel %vm125_vm7, %v390_v31, %v400_v34  ;;  %v406_v39 = vrot.slane %v391_v35, 1  ;;  %v411_v40 = vrot.slane %v391_v35, 2 }
 0x1ae   :  { %v380_v41 = vadd.f32 %v376_v18, %v370_v36 }
 0x1af   :  { %v407_v42 = vsel %vm405_vm13, %v395_v37, %v406_v39  ;;  %v412_v43 = vsel %vm410_vm14, %v399_v23, %v411_v40 }
 0x1b0   :  { %v415_v44 = vrot.slane %v407_v42, 2  ;;  %v417_v45 = vrot.slane %v412_v43, 2  ;;  %vm384_vm15 = vcmp.ge.f32.partialorder %v380_v41, 0.0  ;;  %v388_v46 = vmul.f32 0.2, %v380_v41 }
 0x1b2   :  { %v3280_v47 = vsel %vm125_vm7, %v395_v37, %v415_v44  ;;  %v3283_v48 = vsel %vm125_vm7, %v399_v23, %v417_v45  ;;  %v392_v49 = vsel %vm384_vm15, %v380_v41, %v388_v46 }
 0x1b3   :  { %v408_v51 = vrot.slane %v392_v49, 1  ;;  %v413_v52 = vrot.slane %v392_v49, 2 }
 0x1b5   :  { %v409_v53 = vsel %vm405_vm13, %v396_v50, %v408_v51  ;;  %v414_v54 = vsel %vm410_vm14, %v400_v34, %v413_v52 }
 0x1b6   :  { %v416_v55 = vrot.slane %v409_v53, 2  ;;  %v418_v56 = vrot.slane %v414_v54, 2 }
 0x1b8   :  { %v3288_v57 = vsel %vm125_vm7, %v396_v50, %v416_v55  ;;  %v3291_v58 = vsel %vm125_vm7, %v400_v34, %v418_v56 }
 0x1b9   :  { %3048 = dma.done.wait [#allocation3], 24576 }
 0x1ba   :  { %3049 = vsyncadd [#allocation3], 4294942720  ;;  %v2143_v59 = vld [vmem:[#allocation2 + $0xe0] sm:$0xf]  ;;  %v2855_v60 = vld [vmem:[#allocation2 + $0xec] sm:$0xf0] }
 0x1bb   :  { %v2271_v61 = vld [vmem:[#allocation2 + $0x1e0] sm:$0xf]  ;;  %v2144_v62 = vor.u32 %v2855_v60, %v2143_v59  ;;  %v2887_v63 = vld [vmem:[#allocation2 + $0x1ec] sm:$0xf0] }
 0x1bc   :  { %v2399_v0 = vld [vmem:[#allocation2 + $0x2e0] sm:$0xf]  ;;  %v2919_v1 = vld [vmem:[#allocation2 + $0x2ec] sm:$0xf0]  ;;  %v2272_v2 = vor.u32 %v2887_v63, %v2271_v61 }
 0x1bd   :  { %v2400_v3 = vor.u32 %v2919_v1, %v2399_v0  ;;  %v2527_v4 = vld [vmem:[#allocation2 + $0x3e0] sm:$0xf]  ;;  %v2951_v5 = vld [vmem:[#allocation2 + $0x3ec] sm:$0xf0]  ;;  %1591 = vmatpush.bf16.msrb.mxu0 %v2144_v62 }
 0x1be   :  { %v2127_v6 = vld [vmem:[#allocation2 + $0xc0] sm:$0xf]  ;;  %v2528_v7 = vor.u32 %v2951_v5, %v2527_v4  ;;  %v2851_v8 = vld [vmem:[#allocation2 + $0xcc] sm:$0xf0]  ;;  %1604 = vmatpush.bf16.msrb.mxu1 %v2272_v2 }
 0x1bf   :  { %v2255_v9 = vld [vmem:[#allocation2 + $0x1c0] sm:$0xf]  ;;  %v2883_v10 = vld [vmem:[#allocation2 + $0x1cc] sm:$0xf0]  ;;  %1617 = vmatpush.bf16.msra.mxu2 %v2400_v3  ;;  %v2128_v11 = vor.u32 %v2851_v8, %v2127_v6 }
 0x1c0   :  { %v2256_v12 = vor.u32 %v2883_v10, %v2255_v9  ;;  %v2383_v13 = vld [vmem:[#allocation2 + $0x2c0] sm:$0xf]  ;;  %v2915_v14 = vld [vmem:[#allocation2 + $0x2cc] sm:$0xf0]  ;;  %1630 = vmatpush.bf16.msrb.mxu3 %v2528_v7 }
 0x1c1   :  { %v2511_v15 = vld [vmem:[#allocation2 + $0x3c0] sm:$0xf]  ;;  %v2384_v16 = vor.u32 %v2915_v14, %v2383_v13  ;;  %v2947_v17 = vld [vmem:[#allocation2 + $0x3cc] sm:$0xf0]  ;;  %1592 = vmatpush.bf16.msrb.mxu0 %v2128_v11 }
 0x1c2   :  { %v2111_v18 = vld [vmem:[#allocation2 + $0xa0] sm:$0xf]  ;;  %v2847_v19 = vld [vmem:[#allocation2 + $0xac] sm:$0xf0]  ;;  %v2512_v20 = vor.u32 %v2947_v17, %v2511_v15  ;;  %1605 = vmatpush.bf16.msrb.mxu1 %v2256_v12 }
 0x1c3   :  { %v2239_v21 = vld [vmem:[#allocation2 + $0x1a0] sm:$0xf]  ;;  %v2879_v22 = vld [vmem:[#allocation2 + $0x1ac] sm:$0xf0]  ;;  %v2112_v24 = vor.u32 %v2847_v19, %v2111_v18  ;;  %1618 = vmatpush.bf16.msra.mxu2 %v2384_v16 }
 0x1c4   :  { %v2367_v23 = vld [vmem:[#allocation2 + $0x2a0] sm:$0xf]  ;;  %v2911_v25 = vld [vmem:[#allocation2 + $0x2ac] sm:$0xf0]  ;;  %v2240_v29 = vor.u32 %v2879_v22, %v2239_v21  ;;  %1631 = vmatpush.bf16.msrb.mxu3 %v2512_v20 }
 0x1c5   :  { %v2495_v27 = vld [vmem:[#allocation2 + $0x3a0] sm:$0xf]  ;;  %v2943_v28 = vld [vmem:[#allocation2 + $0x3ac] sm:$0xf0]  ;;  %v2368_v30 = vor.u32 %v2911_v25, %v2367_v23  ;;  %1593 = vmatpush.bf16.msrb.mxu0 %v2112_v24 }
 0x1c6   :  { %v2095_v31 = vld [vmem:[#allocation2 + $0x80] sm:$0xf]  ;;  %v2843_v32 = vld [vmem:[#allocation2 + $0x8c] sm:$0xf0]  ;;  %v2496_v34 = vor.u32 %v2943_v28, %v2495_v27  ;;  %1606 = vmatpush.bf16.msrb.mxu1 %v2240_v29 }
 0x1c7   :  { %v2223_v33 = vld [vmem:[#allocation2 + $0x180] sm:$0xf]  ;;  %v2875_v35 = vld [vmem:[#allocation2 + $0x18c] sm:$0xf0]  ;;  %v2096_v41 = vor.u32 %v2843_v32, %v2095_v31  ;;  %1619 = vmatpush.bf16.msra.mxu2 %v2368_v30 }
 0x1c8   :  { %v2351_v36 = vld [vmem:[#allocation2 + $0x280] sm:$0xf]  ;;  %v2907_v37 = vld [vmem:[#allocation2 + $0x28c] sm:$0xf0]  ;;  %v2224_v42 = vor.u32 %v2875_v35, %v2223_v33  ;;  %1632 = vmatpush.bf16.msrb.mxu3 %v2496_v34  ;;  %v2853_v35 = vld [vmem:[#allocation2 + $0xe4] sm:$0xf] }
 0x1c9   :  { %v2479_v39 = vld [vmem:[#allocation2 + $0x380] sm:$0xf]  ;;  %v2939_v40 = vld [vmem:[#allocation2 + $0x38c] sm:$0xf0]  ;;  %v2352_v43 = vor.u32 %v2907_v37, %v2351_v36  ;;  %1594 = vmatpush.bf16.msrb.mxu0 %v2096_v41  ;;  %v2145_v36 = vld [vmem:[#allocation2 + $0xf0] sm:$0xf0] }
 0x1ca   :  { %v2079_v44 = vld [vmem:[#allocation2 + $0x60] sm:$0xf]  ;;  %v2839_v45 = vld [vmem:[#allocation2 + $0x6c] sm:$0xf0]  ;;  %v2480_v49 = vor.u32 %v2939_v40, %v2479_v39  ;;  %1607 = vmatpush.bf16.msrb.mxu1 %v2224_v42  ;;  %v2885_v40 = vld [vmem:[#allocation2 + $0x1e4] sm:$0xf] }
 0x1cb   :  { %v2207_v46 = vld [vmem:[#allocation2 + $0x160] sm:$0xf]  ;;  %v2871_v50 = vld [vmem:[#allocation2 + $0x16c] sm:$0xf0]  ;;  %v2080_v55 = vor.u32 %v2839_v45, %v2079_v44  ;;  %1620 = vmatpush.bf16.msra.mxu2 %v2352_v43  ;;  %v2273_v41 = vld [vmem:[#allocation2 + $0x1f0] sm:$0xf0]  ;;  %v2148_v45 = vor.u32 %v2853_v35, %v2145_v36 }
 0x1cc   :  { %v2335_v51 = vld [vmem:[#allocation2 + $0x260] sm:$0xf]  ;;  %v2903_v52 = vld [vmem:[#allocation2 + $0x26c] sm:$0xf0]  ;;  %v2208_v56 = vor.u32 %v2871_v50, %v2207_v46  ;;  %1633 = vmatpush.bf16.msrb.mxu3 %v2480_v49 }
 0x1cd   :  { %v2463_v53 = vld [vmem:[#allocation2 + $0x360] sm:$0xf]  ;;  %v2935_v54 = vld [vmem:[#allocation2 + $0x36c] sm:$0xf0]  ;;  %v2336_v59 = vor.u32 %v2903_v52, %v2335_v51  ;;  %1595 = vmatpush.bf16.msrb.mxu0 %v2080_v55  ;;  %v2276_v51 = vor.u32 %v2885_v40, %v2273_v41  ;;  %v3295_v55 = vpack.c.bf16 %v3272_v26, %v3272_v26  ;;  %v2833_v41 = vld [vmem:[#allocation2 + $0x44] sm:$0xf] }
 0x1ce   :  { %v2063_v60 = vld [vmem:[#allocation2 + $0x40] sm:$0xf]  ;;  %v2835_v61 = vld [vmem:[#allocation2 + $0x4c] sm:$0xf0]  ;;  %v2464_v63 = vor.u32 %v2935_v54, %v2463_v53  ;;  %1608 = vmatpush.bf16.msrb.mxu1 %v2208_v56  ;;  %v2849_v53 = vld [vmem:[#allocation2 + $0xc4] sm:$0xf] }
 0x1cf   :  { %v2191_v62 = vld [vmem:[#allocation2 + $0x140] sm:$0xf]  ;;  %v2867_v0 = vld [vmem:[#allocation2 + $0x14c] sm:$0xf0]  ;;  %v2064_v5 = vor.u32 %v2835_v61, %v2063_v60  ;;  %1621 = vmatpush.bf16.msra.mxu2 %v2336_v59  ;;  %v2129_v54 = vld [vmem:[#allocation2 + $0xd0] sm:$0xf0]  ;;  %v3299_v60 = vpack.c.bf16 %v3280_v47, %v3280_v47  ;;  %v3303_v61 = vpack.c.bf16 %v3288_v57, %v3288_v57 }
 0x1d0   :  { %v2319_v1 = vld [vmem:[#allocation2 + $0x240] sm:$0xf]  ;;  %v2899_v2 = vld [vmem:[#allocation2 + $0x24c] sm:$0xf0]  ;;  %v2192_v6 = vor.u32 %v2867_v0, %v2191_v62  ;;  %1634 = vmatpush.bf16.msrb.mxu3 %v2464_v63  ;;  %v2881_v56 = vld [vmem:[#allocation2 + $0x1c4] sm:$0xf]  ;;  %v3307_v63 = vpack.c.bf16 %v3275_v38, %v3275_v38  ;;  %v2132_v0 = vor.u32 %v2849_v53, %v2129_v54 }
 0x1d1   :  { %v2447_v3 = vld [vmem:[#allocation2 + $0x340] sm:$0xf]  ;;  %v2931_v4 = vld [vmem:[#allocation2 + $0x34c] sm:$0xf0]  ;;  %v2320_v7 = vor.u32 %v2899_v2, %v2319_v1  ;;  %1596 = vmatpush.bf16.msrb.mxu0 %v2064_v5  ;;  %v2257_v59 = vld [vmem:[#allocation2 + $0x1d0] sm:$0xf0] }
 0x1d2   :  { %v2047_v8 = vld [vmem:[#allocation2 + $0x20] sm:$0xf]  ;;  %v2831_v9 = vld [vmem:[#allocation2 + $0x2c] sm:$0xf0]  ;;  %v2448_v11 = vor.u32 %v2931_v4, %v2447_v3  ;;  %1609 = vmatpush.bf16.msrb.mxu1 %v2192_v6  ;;  %v2260_v47 = vor.u32 %v2881_v56, %v2257_v59  ;;  %v2845_v5 = vld [vmem:[#allocation2 + $0xa4] sm:$0xf] }
 0x1d3   :  { %v2175_v10 = vld [vmem:[#allocation2 + $0x120] sm:$0xf]  ;;  %v2863_v12 = vld [vmem:[#allocation2 + $0x12c] sm:$0xf0]  ;;  %v2048_v17 = vor.u32 %v2831_v9, %v2047_v8  ;;  %1622 = vmatpush.bf16.msra.mxu2 %v2320_v7  ;;  %v2113_v57 = vld [vmem:[#allocation2 + $0xb0] sm:$0xf0] }
 0x1d4   :  { %v2303_v13 = vld [vmem:[#allocation2 + $0x220] sm:$0xf]  ;;  %v2895_v14 = vld [vmem:[#allocation2 + $0x22c] sm:$0xf0]  ;;  %v2176_v20 = vor.u32 %v2863_v12, %v2175_v10  ;;  %1635 = vmatpush.bf16.msrb.mxu3 %v2448_v11  ;;  %v2877_v6 = vld [vmem:[#allocation2 + $0x1a4] sm:$0xf]  ;;  %v2116_v9 = vor.u32 %v2845_v5, %v2113_v57 }
 0x1d5   :  { %v2431_v15 = vld [vmem:[#allocation2 + $0x320] sm:$0xf]  ;;  %v2927_v16 = vld [vmem:[#allocation2 + $0x32c] sm:$0xf0]  ;;  %v2304_v21 = vor.u32 %v2895_v14, %v2303_v13  ;;  %1597 = vmatpush.bf16.msrb.mxu0 %v2048_v17  ;;  %v2241_v7 = vld [vmem:[#allocation2 + $0x1b0] sm:$0xf0] }
 0x1d6   :  { %v2031_v18 = vld [vmem:[#allocation2] sm:$0xf]  ;;  %v2827_v19 = vld [vmem:[#allocation2 + $0xc] sm:$0xf0]  ;;  %v2432_v25 = vor.u32 %v2927_v16, %v2431_v15  ;;  %1610 = vmatpush.bf16.msrb.mxu1 %v2176_v20  ;;  %v2244_v13 = vor.u32 %v2877_v6, %v2241_v7  ;;  %v2841_v15 = vld [vmem:[#allocation2 + $0x84] sm:$0xf] }
 0x1d7   :  { %v2159_v22 = vld [vmem:[#allocation2 + $0x100] sm:$0xf]  ;;  %v2859_v23 = vld [vmem:[#allocation2 + $0x10c] sm:$0xf0]  ;;  %v2032_v33 = vor.u32 %v2827_v19, %v2031_v18  ;;  %1623 = vmatpush.bf16.msra.mxu2 %v2304_v21  ;;  %v2097_v16 = vld [vmem:[#allocation2 + $0x90] sm:$0xf0] }
 0x1d8   :  { %v2287_v24 = vld [vmem:[#allocation2 + $0x200] sm:$0xf]  ;;  %v2891_v27 = vld [vmem:[#allocation2 + $0x20c] sm:$0xf0]  ;;  %v2160_v37 = vor.u32 %v2859_v23, %v2159_v22  ;;  %1636 = vmatpush.bf16.msrb.mxu3 %v2432_v25  ;;  %v2873_v17 = vld [vmem:[#allocation2 + $0x184] sm:$0xf]  ;;  %v2100_v21 = vor.u32 %v2841_v15, %v2097_v16 }
 0x1d9   :  { %v2415_v28 = vld [vmem:[#allocation2 + $0x300] sm:$0xf]  ;;  %v2923_v29 = vld [vmem:[#allocation2 + $0x30c] sm:$0xf0]  ;;  %v2288_v39 = vor.u32 %v2891_v27, %v2287_v24  ;;  %1598 = vmatpush.bf16.msrb.mxu0 %v2032_v33  ;;  %v2225_v18 = vld [vmem:[#allocation2 + $0x190] sm:$0xf0] }
 0x1da   :  { %v2655_v30 = vld [vmem:[#allocation2 + $0x4e0] sm:$0xf]  ;;  %v2983_v31 = vld [vmem:[#allocation2 + $0x4ec] sm:$0xf0]  ;;  %v2416_v42 = vor.u32 %v2923_v29, %v2415_v28  ;;  %1611 = vmatpush.bf16.msrb.mxu1 %v2160_v37  ;;  %v2228_v25 = vor.u32 %v2873_v17, %v2225_v18  ;;  %v2837_v28 = vld [vmem:[#allocation2 + $0x64] sm:$0xf] }
 0x1db   :  { %v2783_v32 = vld [vmem:[#allocation2 + $0x5e0] sm:$0xf]  ;;  %v3015_v34 = vld [vmem:[#allocation2 + $0x5ec] sm:$0xf0]  ;;  %v2656_v43 = vor.u32 %v2983_v31, %v2655_v30  ;;  %1624 = vmatpush.bf16.msra.mxu2 %v2288_v39  ;;  %v2081_v29 = vld [vmem:[#allocation2 + $0x70] sm:$0xf0] }
 0x1dc   :  { %v2784_v44 = vor.u32 %v3015_v34, %v2783_v32  ;;  %v2639_v46 = vld [vmem:[#allocation2 + $0x4c0] sm:$0xf]  ;;  %v2979_v49 = vld [vmem:[#allocation2 + $0x4cc] sm:$0xf0]  ;;  %1637 = vmatpush.bf16.msrb.mxu3 %v2416_v42  ;;  %1599 = vmatmul.bf16.vlgmr.msrb.gmra.mxu0 %v3295_v55  ;;  %v2869_v30 = vld [vmem:[#allocation2 + $0x164] sm:$0xf]  ;;  %v2084_v34 = vor.u32 %v2837_v28, %v2081_v29 }
 0x1dd   :  { %v2767_v50 = vld [vmem:[#allocation2 + $0x5c0] sm:$0xf]  ;;  %v3011_v52 = vld [vmem:[#allocation2 + $0x5cc] sm:$0xf0]  ;;  %1643 = vmatpush.bf16.msra.mxu0 %v2656_v43  ;;  %v2640_v62 = vor.u32 %v2979_v49, %v2639_v46  ;;  %1612 = vmatmul.bf16.vlgmr.msrb.gmra.mxu1 %v3307_v63  ;;  %v2209_v31 = vld [vmem:[#allocation2 + $0x170] sm:$0xf0] }
 0x1de   :  { %1656 = vmatpush.bf16.msra.mxu1 %v2784_v44  ;;  %v2768_v26 = vor.u32 %v3011_v52, %v2767_v50  ;;  %v2623_v1 = vld [vmem:[#allocation2 + $0x4a0] sm:$0xf]  ;;  %v2975_v2 = vld [vmem:[#allocation2 + $0x4ac] sm:$0xf0]  ;;  %1625 = vmatmul.bf16.vlgmr.msra.gmra.mxu2 %v3299_v60  ;;  %v2212_v39 = vor.u32 %v2869_v30, %v2209_v31  ;;  %v2065_v42 = vld [vmem:[#allocation2 + $0x50] sm:$0xf0] }
 0x1df   :  { %1669 = vmatpush.bf16.msrb.mxu2 %v2148_v45  ;;  %v2751_v3 = vld [vmem:[#allocation2 + $0x5a0] sm:$0xf]  ;;  %v3007_v4 = vld [vmem:[#allocation2 + $0x5ac] sm:$0xf0]  ;;  %1638 = vmatmul.bf16.vlgmr.msrb.gmra.mxu3 %v3303_v61  ;;  %v2624_v38 = vor.u32 %v2975_v2, %v2623_v1  ;;  %v2865_v43 = vld [vmem:[#allocation2 + $0x144] sm:$0xf]  ;;  %v2068_v49 = vor.u32 %v2833_v41, %v2065_v42 }
 0x1e0   :  { %1682 = vmatpush.bf16.msra.mxu3 %v2276_v51  ;;  %v2752_v8 = vor.u32 %v3007_v4, %v2751_v3  ;;  %v2607_v10 = vld [vmem:[#allocation2 + $0x480] sm:$0xf]  ;;  %v2971_v11 = vld [vmem:[#allocation2 + $0x48c] sm:$0xf0]  ;;  %v2193_v44 = vld [vmem:[#allocation2 + $0x150] sm:$0xf0] }
 0x1e1   :  { %1644 = vmatpush.bf16.msra.mxu0 %v2640_v62  ;;  %v2735_v12 = vld [vmem:[#allocation2 + $0x580] sm:$0xf]  ;;  %v3003_v14 = vld [vmem:[#allocation2 + $0x58c] sm:$0xf0]  ;;  %v2608_v19 = vor.u32 %v2971_v11, %v2607_v10  ;;  %v2196_v53 = vor.u32 %v2865_v43, %v2193_v44  ;;  %v2829_v56 = vld [vmem:[#allocation2 + $0x24] sm:$0xf] }
 0x1e2   :  { %1657 = vmatpush.bf16.msra.mxu1 %v2768_v26  ;;  %v2736_v20 = vor.u32 %v3003_v14, %v2735_v12  ;;  %v2591_v22 = vld [vmem:[#allocation2 + $0x460] sm:$0xf]  ;;  %v2967_v23 = vld [vmem:[#allocation2 + $0x46c] sm:$0xf0]  ;;  %v2049_v59 = vld [vmem:[#allocation2 + $0x30] sm:$0xf0] }
 0x1e3   :  { %1670 = vmatpush.bf16.msrb.mxu2 %v2132_v0  ;;  %v2719_v24 = vld [vmem:[#allocation2 + $0x560] sm:$0xf]  ;;  %v2999_v27 = vld [vmem:[#allocation2 + $0x56c] sm:$0xf0]  ;;  %v2592_v32 = vor.u32 %v2967_v23, %v2591_v22  ;;  %v2861_v62 = vld [vmem:[#allocation2 + $0x124] sm:$0xf] }
 0x1e4   :  { %1683 = vmatpush.bf16.msra.mxu3 %v2260_v47  ;;  %v2720_v33 = vor.u32 %v2999_v27, %v2719_v24  ;;  %v2575_v35 = vld [vmem:[#allocation2 + $0x440] sm:$0xf]  ;;  %v2963_v36 = vld [vmem:[#allocation2 + $0x44c] sm:$0xf0]  ;;  %v2177_v26 = vld [vmem:[#allocation2 + $0x130] sm:$0xf0]  ;;  %v2052_v47 = vor.u32 %v2829_v56, %v2049_v59 }
 0x1e5   :  { %1645 = vmatpush.bf16.msra.mxu0 %v2624_v38  ;;  %v2703_v37 = vld [vmem:[#allocation2 + $0x540] sm:$0xf]  ;;  %v2995_v40 = vld [vmem:[#allocation2 + $0x54c] sm:$0xf0]  ;;  %v2576_v45 = vor.u32 %v2963_v36, %v2575_v35  ;;  %v2825_v57 = vld [vmem:[#allocation2 + $0x4] sm:$0xf]  ;;  %v2180_v6 = vor.u32 %v2861_v62, %v2177_v26  ;;  %v3319_v35 = vpack.c.bf16 %v3291_v58, %v3291_v58 }
 0x1e6   :  { %1658 = vmatpush.bf16.msra.mxu1 %v2752_v8  ;;  %v2704_v46 = vor.u32 %v2995_v40, %v2703_v37  ;;  %v2559_v50 = vld [vmem:[#allocation2 + $0x420] sm:$0xf]  ;;  %v2959_v51 = vld [vmem:[#allocation2 + $0x42c] sm:$0xf0]  ;;  %v2033_v7 = vld [vmem:[#allocation2 + $0x10] sm:$0xf0] }
 0x1e7   :  { %1671 = vmatpush.bf16.msrb.mxu2 %v2116_v9  ;;  %v2687_v52 = vld [vmem:[#allocation2 + $0x520] sm:$0xf]  ;;  %v2991_v54 = vld [vmem:[#allocation2 + $0x52c] sm:$0xf0]  ;;  %v2560_v0 = vor.u32 %v2959_v51, %v2559_v50  ;;  %v2857_v38 = vld [vmem:[#allocation2 + $0x104] sm:$0xf]  ;;  %v2036_v17 = vor.u32 %v2825_v57, %v2033_v7 }
 0x1e8   :  { %1684 = vmatpush.bf16.msra.mxu3 %v2244_v13  ;;  %v2543_v1 = vld [vmem:[#allocation2 + $0x400] sm:$0xf]  ;;  %v2955_v2 = vld [vmem:[#allocation2 + $0x40c] sm:$0xf0]  ;;  %v2688_v3 = vor.u32 %v2991_v54, %v2687_v52  ;;  %v2161_v8 = vld [vmem:[#allocation2 + $0x110] sm:$0xf0] }
 0x1e9   :  { %1646 = vmatpush.bf16.msra.mxu0 %v2608_v19  ;;  %v2671_v4 = vld [vmem:[#allocation2 + $0x500] sm:$0xf]  ;;  %v2987_v5 = vld [vmem:[#allocation2 + $0x50c] sm:$0xf0]  ;;  %v2917_v9 = vld [vmem:[#allocation2 + $0x2e4] sm:$0xf]  ;;  %v2544_v12 = vor.u32 %v2955_v2, %v2543_v1 }
 0x1ea   :  { %1659 = vmatpush.bf16.msra.mxu1 %v2736_v20  ;;  %v2401_v10 = vld [vmem:[#allocation2 + $0x2f0] sm:$0xf0]  ;;  %v2949_v11 = vld [vmem:[#allocation2 + $0x3e4] sm:$0xf]  ;;  %v2672_v16 = vor.u32 %v2987_v5, %v2671_v4  ;;  %v2164_v20 = vor.u32 %v2857_v38, %v2161_v8 }
 0x1eb   :  { %1672 = vmatpush.bf16.msrb.mxu2 %v2100_v21  ;;  %v2529_v13 = vld [vmem:[#allocation2 + $0x3f0] sm:$0xf0]  ;;  %v2981_v14 = vld [vmem:[#allocation2 + $0x4e4] sm:$0xf]  ;;  %v2404_v21 = vor.u32 %v2917_v9, %v2401_v10 }
 0x1ec   :  { %1685 = vmatpush.bf16.msra.mxu3 %v2228_v25  ;;  %v2657_v15 = vld [vmem:[#allocation2 + $0x4f0] sm:$0xf0]  ;;  %v3013_v18 = vld [vmem:[#allocation2 + $0x5e4] sm:$0xf]  ;;  %v2532_v22 = vor.u32 %v2949_v11, %v2529_v13 }
 0x1ed   :  { %1647 = vmatpush.bf16.msra.mxu0 %v2592_v32  ;;  %v2785_v19 = vld [vmem:[#allocation2 + $0x5f0] sm:$0xf0]  ;;  %v2660_v23 = vor.u32 %v2981_v14, %v2657_v15  ;;  %v2913_v24 = vld [vmem:[#allocation2 + $0x2c4] sm:$0xf]  ;;  %v3315_v32 = vpack.c.bf16 %v3283_v48, %v3283_v48 }
 0x1ee   :  { %1660 = vmatpush.bf16.msra.mxu1 %v2720_v33  ;;  %v2385_v25 = vld [vmem:[#allocation2 + $0x2d0] sm:$0xf0]  ;;  %v2945_v27 = vld [vmem:[#allocation2 + $0x3c4] sm:$0xf]  ;;  %v2788_v28 = vor.u32 %v3013_v18, %v2785_v19 }
 0x1ef   :  { %1673 = vmatpush.bf16.msrb.mxu2 %v2084_v34  ;;  %v2513_v29 = vld [vmem:[#allocation2 + $0x3d0] sm:$0xf0]  ;;  %v2977_v30 = vld [vmem:[#allocation2 + $0x4c4] sm:$0xf]  ;;  %v2388_v36 = vor.u32 %v2913_v24, %v2385_v25 }
 0x1f0   :  { %1686 = vmatpush.bf16.msra.mxu3 %v2212_v39  ;;  %v2641_v31 = vld [vmem:[#allocation2 + $0x4d0] sm:$0xf0]  ;;  %v3009_v33 = vld [vmem:[#allocation2 + $0x5c4] sm:$0xf]  ;;  %v2516_v37 = vor.u32 %v2945_v27, %v2513_v29 }
 0x1f1   :  { %1648 = vmatpush.bf16.msra.mxu0 %v2576_v45  ;;  %v2769_v34 = vld [vmem:[#allocation2 + $0x5d0] sm:$0xf0]  ;;  %v2644_v39 = vor.u32 %v2977_v30, %v2641_v31  ;;  %v2909_v40 = vld [vmem:[#allocation2 + $0x2a4] sm:$0xf] }
 0x1f2   :  { %1661 = vmatpush.bf16.msra.mxu1 %v2704_v46  ;;  %v2369_v41 = vld [vmem:[#allocation2 + $0x2b0] sm:$0xf0]  ;;  %v2941_v42 = vld [vmem:[#allocation2 + $0x3a4] sm:$0xf]  ;;  %v2772_v48 = vor.u32 %v3009_v33, %v2769_v34 }
 0x1f3   :  { %1674 = vmatpush.bf16.msrb.mxu2 %v2068_v49  ;;  %v2497_v43 = vld [vmem:[#allocation2 + $0x3b0] sm:$0xf0]  ;;  %v2973_v44 = vld [vmem:[#allocation2 + $0x4a4] sm:$0xf]  ;;  %v2372_v49 = vor.u32 %v2909_v40, %v2369_v41 }
 0x1f4   :  { %1687 = vmatpush.bf16.msra.mxu3 %v2196_v53  ;;  %v2625_v45 = vld [vmem:[#allocation2 + $0x4b0] sm:$0xf0]  ;;  %v3005_v46 = vld [vmem:[#allocation2 + $0x5a4] sm:$0xf]  ;;  %v2500_v50 = vor.u32 %v2941_v42, %v2497_v43 }
 0x1f5   :  { %1649 = vmatpush.bf16.msra.mxu0 %v2560_v0  ;;  %v2753_v58 = vld [vmem:[#allocation2 + $0x5b0] sm:$0xf0]  ;;  %v2628_v51 = vor.u32 %v2973_v44, %v2625_v45  ;;  %v2905_v52 = vld [vmem:[#allocation2 + $0x284] sm:$0xf] }
 0x1f6   :  { %1662 = vmatpush.bf16.msra.mxu1 %v2688_v3  ;;  %v2353_v53 = vld [vmem:[#allocation2 + $0x290] sm:$0xf0]  ;;  %v2937_v54 = vld [vmem:[#allocation2 + $0x384] sm:$0xf]  ;;  %v2756_v56 = vor.u32 %v3005_v46, %v2753_v58 }
 0x1f7   :  { %1675 = vmatpush.bf16.msrb.mxu2 %v2052_v47  ;;  %v2481_v59 = vld [vmem:[#allocation2 + $0x390] sm:$0xf0]  ;;  %v2969_v62 = vld [vmem:[#allocation2 + $0x484] sm:$0xf]  ;;  %v2356_v2 = vor.u32 %v2905_v52, %v2353_v53  ;;  %v2856_v52 = vld [vmem:[#allocation2 + $0xf4] sm:$0xf0] }
 0x1f8   :  { %1688 = vmatpush.bf16.msra.mxu3 %v2180_v6  ;;  %v2609_v26 = vld [vmem:[#allocation2 + $0x490] sm:$0xf0]  ;;  %v3001_v0 = vld [vmem:[#allocation2 + $0x584] sm:$0xf]  ;;  %v2484_v3 = vor.u32 %v2937_v54, %v2481_v59  ;;  %v2279_v53 = vld [vmem:[#allocation2 + $0x1e8] sm:$0xf] }
 0x1f9   :  { %1650 = vmatpush.bf16.msra.mxu0 %v2544_v12  ;;  %v2737_v1 = vld [vmem:[#allocation2 + $0x590] sm:$0xf0]  ;;  %v2612_v47 = vor.u32 %v2969_v62, %v2609_v26  ;;  %v2901_v4 = vld [vmem:[#allocation2 + $0x264] sm:$0xf]  ;;  %v2407_v59 = vld [vmem:[#allocation2 + $0x2e8] sm:$0xf] }
 0x1fa   :  { %1663 = vmatpush.bf16.msra.mxu1 %v2672_v16  ;;  %v2337_v5 = vld [vmem:[#allocation2 + $0x270] sm:$0xf0]  ;;  %v2933_v57 = vld [vmem:[#allocation2 + $0x364] sm:$0xf]  ;;  %v2740_v6 = vor.u32 %v3001_v0, %v2737_v1  ;;  %v2920_v62 = vld [vmem:[#allocation2 + $0x2f4] sm:$0xf0] }
 0x1fb   :  { %1676 = vmatpush.bf16.msrb.mxu2 %v2036_v17  ;;  %v2465_v7 = vld [vmem:[#allocation2 + $0x370] sm:$0xf0]  ;;  %v2965_v38 = vld [vmem:[#allocation2 + $0x464] sm:$0xf]  ;;  %v2340_v11 = vor.u32 %v2901_v4, %v2337_v5  ;;  %v2535_v1 = vld [vmem:[#allocation2 + $0x3e8] sm:$0xf]  ;;  %v2408_v5 = vor.u32 %v2920_v62, %v2407_v59 }
 0x1fc   :  { %1689 = vmatpush.bf16.msra.mxu3 %v2164_v20  ;;  %1651 = vmatmul.bf16.vlgmr.msra.gmra.mxu0 %v3315_v32  ;;  %v2593_v8 = vld [vmem:[#allocation2 + $0x470] sm:$0xf0]  ;;  %v2997_v9 = vld [vmem:[#allocation2 + $0x564] sm:$0xf]  ;;  %v2468_v12 = vor.u32 %v2933_v57, %v2465_v7  ;;  %v2135_v57 = vld [vmem:[#allocation2 + $0xc8] sm:$0xf] }
 0x1fd   :  { %1695 = vmatpush.bf16.msrb.mxu0 %v2404_v21  ;;  %1664 = vmatmul.bf16.vlgmr.msra.gmra.mxu1 %v3319_v35  ;;  %v2721_v10 = vld [vmem:[#allocation2 + $0x570] sm:$0xf0]  ;;  %v2596_v13 = vor.u32 %v2965_v38, %v2593_v8  ;;  %v2897_v14 = vld [vmem:[#allocation2 + $0x244] sm:$0xf]  ;;  %v2263_v7 = vld [vmem:[#allocation2 + $0x1c8] sm:$0xf] }
 0x1fe   :  { %1708 = vmatpush.bf16.msrb.mxu1 %v2532_v22  ;;  %1677 = vmatmul.bf16.vlgmr.msrb.gmra.mxu2 %v3295_v55  ;;  %v2321_v15 = vld [vmem:[#allocation2 + $0x250] sm:$0xf0]  ;;  %v2929_v16 = vld [vmem:[#allocation2 + $0x344] sm:$0xf]  ;;  %v2724_v17 = vor.u32 %v2997_v9, %v2721_v10  ;;  %v2884_v8 = vld [vmem:[#allocation2 + $0x1d4] sm:$0xf0] }
 0x1ff   :  { %1721 = vmatpush.bf16.msra.mxu2 %v2660_v23  ;;  %1690 = vmatmul.bf16.vlgmr.msra.gmra.mxu3 %v3307_v63  ;;  %v2449_v18 = vld [vmem:[#allocation2 + $0x350] sm:$0xf0]  ;;  %v2961_v19 = vld [vmem:[#allocation2 + $0x444] sm:$0xf]  ;;  %v2324_v23 = vor.u32 %v2897_v14, %v2321_v15  ;;  %v2391_v9 = vld [vmem:[#allocation2 + $0x2c8] sm:$0xf]  ;;  %v2264_v14 = vor.u32 %v2884_v8, %v2263_v7 }
 0x200   :  { %1734 = vmatpush.bf16.msrb.mxu3 %v2788_v28  ;;  %v2577_v20 = vld [vmem:[#allocation2 + $0x450] sm:$0xf0]  ;;  %v2993_v21 = vld [vmem:[#allocation2 + $0x544] sm:$0xf]  ;;  %v2452_v24 = vor.u32 %v2929_v16, %v2449_v18  ;;  %v2916_v10 = vld [vmem:[#allocation2 + $0x2d4] sm:$0xf0] }
 0x201   :  { %1696 = vmatpush.bf16.msrb.mxu0 %v2388_v36  ;;  %v2705_v22 = vld [vmem:[#allocation2 + $0x550] sm:$0xf0]  ;;  %v2580_v25 = vor.u32 %v2961_v19, %v2577_v20  ;;  %v2893_v27 = vld [vmem:[#allocation2 + $0x224] sm:$0xf]  ;;  %v2392_v15 = vor.u32 %v2916_v10, %v2391_v9  ;;  %v2119_v16 = vld [vmem:[#allocation2 + $0xa8] sm:$0xf] }
 0x202   :  { %1709 = vmatpush.bf16.msrb.mxu1 %v2516_v37  ;;  %v2305_v28 = vld [vmem:[#allocation2 + $0x230] sm:$0xf0]  ;;  %v2925_v29 = vld [vmem:[#allocation2 + $0x324] sm:$0xf]  ;;  %v2708_v30 = vor.u32 %v2993_v21, %v2705_v22  ;;  %v2247_v18 = vld [vmem:[#allocation2 + $0x1a8] sm:$0xf] }
 0x203   :  { %1722 = vmatpush.bf16.msra.mxu2 %v2644_v39  ;;  %v2433_v31 = vld [vmem:[#allocation2 + $0x330] sm:$0xf0]  ;;  %v2957_v33 = vld [vmem:[#allocation2 + $0x424] sm:$0xf]  ;;  %v2308_v39 = vor.u32 %v2893_v27, %v2305_v28  ;;  %v2880_v20 = vld [vmem:[#allocation2 + $0x1b4] sm:$0xf0] }
 0x204   :  { %1735 = vmatpush.bf16.msrb.mxu3 %v2772_v48  ;;  %v2561_v34 = vld [vmem:[#allocation2 + $0x430] sm:$0xf0]  ;;  %v2989_v36 = vld [vmem:[#allocation2 + $0x524] sm:$0xf]  ;;  %v2436_v42 = vor.u32 %v2925_v29, %v2433_v31  ;;  %v2375_v21 = vld [vmem:[#allocation2 + $0x2a8] sm:$0xf]  ;;  %v2248_v27 = vor.u32 %v2880_v20, %v2247_v18 }
 0x205   :  { %1697 = vmatpush.bf16.msrb.mxu0 %v2372_v49  ;;  %v2689_v37 = vld [vmem:[#allocation2 + $0x530] sm:$0xf0]  ;;  %v2889_v40 = vld [vmem:[#allocation2 + $0x204] sm:$0xf]  ;;  %v2564_v48 = vor.u32 %v2957_v33, %v2561_v34  ;;  %v2912_v22 = vld [vmem:[#allocation2 + $0x2b4] sm:$0xf0] }
 0x206   :  { %1710 = vmatpush.bf16.msrb.mxu1 %v2500_v50  ;;  %v2289_v41 = vld [vmem:[#allocation2 + $0x210] sm:$0xf0]  ;;  %v2921_v43 = vld [vmem:[#allocation2 + $0x304] sm:$0xf]  ;;  %v2692_v46 = vor.u32 %v2989_v36, %v2689_v37  ;;  %v2376_v28 = vor.u32 %v2912_v22, %v2375_v21  ;;  %v2103_v29 = vld [vmem:[#allocation2 + $0x88] sm:$0xf] }
 0x207   :  { %1723 = vmatpush.bf16.msra.mxu2 %v2628_v51  ;;  %v2417_v44 = vld [vmem:[#allocation2 + $0x310] sm:$0xf0]  ;;  %v2953_v45 = vld [vmem:[#allocation2 + $0x404] sm:$0xf]  ;;  %v2151_v51 = vld [vmem:[#allocation2 + $0xe8] sm:$0xf]  ;;  %v2292_v54 = vor.u32 %v2889_v40, %v2289_v41 }
 0x208   :  { %1736 = vmatpush.bf16.msrb.mxu3 %v2756_v56  ;;  %v2545_v58 = vld [vmem:[#allocation2 + $0x410] sm:$0xf0]  ;;  %v2985_v49 = vld [vmem:[#allocation2 + $0x504] sm:$0xf]  ;;  %v2888_v56 = vld [vmem:[#allocation2 + $0x1f4] sm:$0xf0]  ;;  %v2420_v26 = vor.u32 %v2921_v43, %v2417_v44 }
 0x209   :  { %1698 = vmatpush.bf16.msrb.mxu0 %v2356_v2  ;;  %v2673_v50 = vld [vmem:[#allocation2 + $0x510] sm:$0xf0]  ;;  %v2548_v0 = vor.u32 %v2953_v45, %v2545_v58  ;;  %v2952_v2 = vld [vmem:[#allocation2 + $0x3f4] sm:$0xf0]  ;;  %v2280_v4 = vor.u32 %v2888_v56, %v2279_v53  ;;  %v2231_v31 = vld [vmem:[#allocation2 + $0x188] sm:$0xf] }
 0x20a   :  { %1711 = vmatpush.bf16.msrb.mxu1 %v2484_v3  ;;  %v2676_v3 = vor.u32 %v2985_v49, %v2673_v50  ;;  %v2536_v38 = vor.u32 %v2952_v2, %v2535_v1  ;;  %v2876_v34 = vld [vmem:[#allocation2 + $0x194] sm:$0xf0]  ;;  %v2359_v36 = vld [vmem:[#allocation2 + $0x288] sm:$0xf] }
 0x20b   :  { %1724 = vmatpush.bf16.msra.mxu2 %v2612_v47  ;;  %v2152_v47 = vor.u32 %v2856_v52, %v2151_v51  ;;  %v2908_v37 = vld [vmem:[#allocation2 + $0x294] sm:$0xf0]  ;;  %v2087_v43 = vld [vmem:[#allocation2 + $0x68] sm:$0xf] }
 0x20c   :  { %1737 = vmatpush.bf16.msrb.mxu3 %v2740_v6  ;;  %v2852_v6 = vld [vmem:[#allocation2 + $0xd4] sm:$0xf0]  ;;  %v2215_v45 = vld [vmem:[#allocation2 + $0x168] sm:$0xf] }
 0x20d   :  { %1699 = vmatpush.bf16.msrb.mxu0 %v2340_v11  ;;  %v2519_v11 = vld [vmem:[#allocation2 + $0x3c8] sm:$0xf]  ;;  %v2940_v40 = vld [vmem:[#allocation2 + $0x394] sm:$0xf0] }
 0x20e   :  { %1712 = vmatpush.bf16.msrb.mxu1 %v2468_v12  ;;  %v2948_v12 = vld [vmem:[#allocation2 + $0x3d4] sm:$0xf0]  ;;  %v2343_v49 = vld [vmem:[#allocation2 + $0x268] sm:$0xf] }
 0x20f   :  { %1725 = vmatpush.bf16.msra.mxu2 %v2596_v13  ;;  %v2136_v13 = vor.u32 %v2852_v6, %v2135_v57  ;;  %v2520_v19 = vor.u32 %v2948_v12, %v2519_v11  ;;  %v2840_v44 = vld [vmem:[#allocation2 + $0x74] sm:$0xf0]  ;;  %v2471_v51 = vld [vmem:[#allocation2 + $0x368] sm:$0xf] }
 0x210   :  { %1738 = vmatpush.bf16.msrb.mxu3 %v2724_v17  ;;  %v2848_v17 = vld [vmem:[#allocation2 + $0xb4] sm:$0xf0]  ;;  %v2088_v53 = vor.u32 %v2840_v44, %v2087_v43  ;;  %v2071_v59 = vld [vmem:[#allocation2 + $0x48] sm:$0xf] }
 0x211   :  { %1700 = vmatpush.bf16.msrb.mxu0 %v2324_v23  ;;  %v2503_v23 = vld [vmem:[#allocation2 + $0x3a8] sm:$0xf]  ;;  %v2872_v58 = vld [vmem:[#allocation2 + $0x174] sm:$0xf0] }
 0x212   :  { %1713 = vmatpush.bf16.msrb.mxu1 %v2452_v24  ;;  %v2944_v24 = vld [vmem:[#allocation2 + $0x3b4] sm:$0xf0]  ;;  %v2327_v2 = vld [vmem:[#allocation2 + $0x248] sm:$0xf] }
 0x213   :  { %1726 = vmatpush.bf16.msra.mxu2 %v2580_v25  ;;  %v2120_v25 = vor.u32 %v2848_v17, %v2119_v16  ;;  %v2504_v33 = vor.u32 %v2944_v24, %v2503_v23  ;;  %v2904_v50 = vld [vmem:[#allocation2 + $0x274] sm:$0xf0]  ;;  %v2055_v7 = vld [vmem:[#allocation2 + $0x28] sm:$0xf] }
 0x214   :  { %1739 = vmatpush.bf16.msrb.mxu3 %v2708_v30  ;;  %v2844_v30 = vld [vmem:[#allocation2 + $0x94] sm:$0xf0]  ;;  %v2344_v56 = vor.u32 %v2904_v50, %v2343_v49  ;;  %v2183_v8 = vld [vmem:[#allocation2 + $0x128] sm:$0xf] }
 0x215   :  { %1701 = vmatpush.bf16.msrb.mxu0 %v2308_v39  ;;  %v2487_v39 = vld [vmem:[#allocation2 + $0x388] sm:$0xf]  ;;  %v2104_v41 = vor.u32 %v2844_v30, %v2103_v29  ;;  %v2936_v52 = vld [vmem:[#allocation2 + $0x374] sm:$0xf0] }
 0x216   :  { %1714 = vmatpush.bf16.msrb.mxu1 %v2436_v42  ;;  %v2232_v42 = vor.u32 %v2876_v34, %v2231_v31  ;;  %v2836_v62 = vld [vmem:[#allocation2 + $0x54] sm:$0xf0]  ;;  %v2311_v11 = vld [vmem:[#allocation2 + $0x228] sm:$0xf]  ;;  %v2854_v34 = vld [vmem:[#allocation2 + $0xec] sm:$0xf] }
 0x217   :  { %1727 = vmatpush.bf16.msra.mxu2 %v2564_v48  ;;  %v2360_v48 = vor.u32 %v2908_v37, %v2359_v36  ;;  %v2868_v1 = vld [vmem:[#allocation2 + $0x154] sm:$0xf0]  ;;  %v2039_v16 = vld [vmem:[#allocation2 + $0x8] sm:$0xf]  ;;  %v2153_v36 = vld [vmem:[#allocation2 + $0xf8] sm:$0xf0] }
 0x218   :  { %1740 = vmatpush.bf16.msrb.mxu3 %v2692_v46  ;;  %v2488_v46 = vor.u32 %v2940_v40, %v2487_v39  ;;  %v2864_v10 = vld [vmem:[#allocation2 + $0x134] sm:$0xf0]  ;;  %v2167_v20 = vld [vmem:[#allocation2 + $0x108] sm:$0xf]  ;;  %v2886_v40 = vld [vmem:[#allocation2 + $0x1ec] sm:$0xf]  ;;  %v2156_v44 = vor.u32 %v2854_v34, %v2153_v36 }
 0x219   :  { %1702 = vmatpush.bf16.msrb.mxu0 %v2292_v54  ;;  %v2216_v54 = vor.u32 %v2872_v58, %v2215_v45  ;;  %v2896_v12 = vld [vmem:[#allocation2 + $0x234] sm:$0xf0]  ;;  %v2184_v18 = vor.u32 %v2864_v10, %v2183_v8  ;;  %v2295_v22 = vld [vmem:[#allocation2 + $0x208] sm:$0xf] }
 0x21a   :  { %1715 = vmatpush.bf16.msrb.mxu1 %v2420_v26  ;;  %v2199_v26 = vld [vmem:[#allocation2 + $0x148] sm:$0xf]  ;;  %v2828_v17 = vld [vmem:[#allocation2 + $0x14] sm:$0xf0] }
 0x21b   :  { %1728 = vmatpush.bf16.msra.mxu2 %v2548_v0  ;;  %v2472_v0 = vor.u32 %v2936_v52, %v2471_v51  ;;  %v2200_v57 = vor.u32 %v2868_v1, %v2199_v26  ;;  %v2860_v21 = vld [vmem:[#allocation2 + $0x114] sm:$0xf0]  ;;  %v2791_v30 = vld [vmem:[#allocation2 + $0x5e8] sm:$0xf]  ;;  %v2040_v31 = vor.u32 %v2828_v17, %v2039_v16  ;;  %v2850_v51 = vld [vmem:[#allocation2 + $0xcc] sm:$0xf] }
 0x21c   :  { %1741 = vmatpush.bf16.msrb.mxu3 %v2676_v3  ;;  %1703 = vmatmul.bf16.vlgmr.msrb.gmra.mxu0 %v3299_v60  ;;  %v2900_v3 = vld [vmem:[#allocation2 + $0x254] sm:$0xf0]  ;;  %v2168_v37 = vor.u32 %v2860_v21, %v2167_v20  ;;  %v2647_v45 = vld [vmem:[#allocation2 + $0x4c8] sm:$0xf]  ;;  %v2137_v52 = vld [vmem:[#allocation2 + $0xd8] sm:$0xf0] }
 0x21d   :  { %1747 = vmatpush.bf16.msra.mxu0 %v2152_v47  ;;  %1716 = vmatmul.bf16.vlgmr.msrb.gmra.mxu1 %v3303_v61  ;;  %v2455_v47 = vld [vmem:[#allocation2 + $0x348] sm:$0xf]  ;;  %v2328_v6 = vor.u32 %v2900_v3, %v2327_v2  ;;  %v2892_v24 = vld [vmem:[#allocation2 + $0x214] sm:$0xf0]  ;;  %v2233_v16 = vld [vmem:[#allocation2 + $0x198] sm:$0xf0] }
 0x21e   :  { %1760 = vmatpush.bf16.msra.mxu1 %v2280_v4  ;;  %1729 = vmatmul.bf16.vlgmr.msra.gmra.mxu2 %v3315_v32  ;;  %v2932_v4 = vld [vmem:[#allocation2 + $0x354] sm:$0xf0]  ;;  %v2296_v39 = vor.u32 %v2892_v24, %v2295_v22  ;;  %v2775_v58 = vld [vmem:[#allocation2 + $0x5c8] sm:$0xf] }
 0x21f   :  { %1773 = vmatpush.bf16.msrb.mxu2 %v2408_v5  ;;  %1742 = vmatmul.bf16.vlgmr.msrb.gmra.mxu3 %v3319_v35  ;;  %v2072_v5 = vor.u32 %v2836_v62, %v2071_v59  ;;  %v2456_v9 = vor.u32 %v2932_v4, %v2455_v47  ;;  %v2984_v29 = vld [vmem:[#allocation2 + $0x4f4] sm:$0xf0]  ;;  %v2140_v62 = vor.u32 %v2850_v51, %v2137_v52  ;;  %v2631_v26 = vld [vmem:[#allocation2 + $0x4a8] sm:$0xf]  ;;  %v2846_v47 = vld [vmem:[#allocation2 + $0xac] sm:$0xf] }
 0x220   :  { %1786 = vmatpush.bf16.msra.mxu3 %v2536_v38  ;;  %v2832_v38 = vld [vmem:[#allocation2 + $0x34] sm:$0xf0]  ;;  %v2759_v1 = vld [vmem:[#allocation2 + $0x5a8] sm:$0xf]  ;;  %v2121_v4 = vld [vmem:[#allocation2 + $0xb8] sm:$0xf0] }
 0x221   :  { %1748 = vmatpush.bf16.msra.mxu0 %v2136_v13  ;;  %v2439_v13 = vld [vmem:[#allocation2 + $0x328] sm:$0xf]  ;;  %v3012_v50 = vld [vmem:[#allocation2 + $0x5d4] sm:$0xf0] }
 0x222   :  { %1761 = vmatpush.bf16.msra.mxu1 %v2264_v14  ;;  %v2928_v14 = vld [vmem:[#allocation2 + $0x334] sm:$0xf0]  ;;  %v2776_v59 = vor.u32 %v3012_v50, %v2775_v58  ;;  %v2615_v8 = vld [vmem:[#allocation2 + $0x488] sm:$0xf] }
 0x223   :  { %1774 = vmatpush.bf16.msrb.mxu2 %v2392_v15  ;;  %v2056_v15 = vor.u32 %v2832_v38, %v2055_v7  ;;  %v2440_v23 = vor.u32 %v2928_v14, %v2439_v13  ;;  %v3008_v3 = vld [vmem:[#allocation2 + $0x5b4] sm:$0xf0]  ;;  %v2124_v38 = vor.u32 %v2846_v47, %v2121_v4  ;;  %v2743_v10 = vld [vmem:[#allocation2 + $0x588] sm:$0xf]  ;;  %v2842_v13 = vld [vmem:[#allocation2 + $0x8c] sm:$0xf] }
 0x224   :  { %1787 = vmatpush.bf16.msra.mxu3 %v2520_v19  ;;  %v2312_v19 = vor.u32 %v2896_v12, %v2311_v11  ;;  %v2760_v7 = vor.u32 %v3008_v3, %v2759_v1  ;;  %v3004_v12 = vld [vmem:[#allocation2 + $0x594] sm:$0xf0]  ;;  %v2105_v14 = vld [vmem:[#allocation2 + $0x98] sm:$0xf0]  ;;  %v2599_v20 = vld [vmem:[#allocation2 + $0x468] sm:$0xf] }
 0x225   :  { %1749 = vmatpush.bf16.msra.mxu0 %v2120_v25  ;;  %v2423_v25 = vld [vmem:[#allocation2 + $0x308] sm:$0xf]  ;;  %v2968_v21 = vld [vmem:[#allocation2 + $0x474] sm:$0xf0]  ;;  %v2826_v4 = vld [vmem:[#allocation2 + $0xc] sm:$0xf] }
 0x226   :  { %1762 = vmatpush.bf16.msra.mxu1 %v2248_v27  ;;  %v2924_v27 = vld [vmem:[#allocation2 + $0x314] sm:$0xf0]  ;;  %v2727_v22 = vld [vmem:[#allocation2 + $0x568] sm:$0xf] }
 0x227   :  { %1775 = vmatpush.bf16.msrb.mxu2 %v2376_v28  ;;  %v2663_v28 = vld [vmem:[#allocation2 + $0x4e8] sm:$0xf]  ;;  %v3000_v24 = vld [vmem:[#allocation2 + $0x574] sm:$0xf0] }
 0x228   :  { %1788 = vmatpush.bf16.msra.mxu3 %v2504_v33  ;;  %v3016_v33 = vld [vmem:[#allocation2 + $0x5f4] sm:$0xf0]  ;;  %v2583_v34 = vld [vmem:[#allocation2 + $0x448] sm:$0xf] }
 0x229   :  { %1750 = vmatpush.bf16.msra.mxu0 %v2104_v41  ;;  %v2281_v41 = vld [vmem:[#allocation2 + $0x1f8] sm:$0xf0]  ;;  %v2792_v43 = vor.u32 %v3016_v33, %v2791_v30  ;;  %v2600_v30 = vor.u32 %v2968_v21, %v2599_v20  ;;  %v2964_v36 = vld [vmem:[#allocation2 + $0x454] sm:$0xf0]  ;;  %v2567_v58 = vld [vmem:[#allocation2 + $0x428] sm:$0xf] }
 0x22a   :  { %1763 = vmatpush.bf16.msra.mxu1 %v2232_v42  ;;  %v2424_v42 = vor.u32 %v2924_v27, %v2423_v25  ;;  %v2284_v49 = vor.u32 %v2886_v40, %v2281_v41  ;;  %v2838_v25 = vld [vmem:[#allocation2 + $0x6c] sm:$0xf]  ;;  %v2089_v27 = vld [vmem:[#allocation2 + $0x78] sm:$0xf0]  ;;  %v2996_v40 = vld [vmem:[#allocation2 + $0x554] sm:$0xf0] }
 0x22b   :  { %1776 = vmatpush.bf16.msrb.mxu2 %v2360_v48  ;;  %v2664_v48 = vor.u32 %v2984_v29, %v2663_v28  ;;  %v2870_v28 = vld [vmem:[#allocation2 + $0x16c] sm:$0xf]  ;;  %v2217_v29 = vld [vmem:[#allocation2 + $0x178] sm:$0xf0]  ;;  %v2092_v33 = vor.u32 %v2838_v25, %v2089_v27  ;;  %v2695_v50 = vld [vmem:[#allocation2 + $0x528] sm:$0xf] }
 0x22c   :  { %1789 = vmatpush.bf16.msra.mxu3 %v2488_v46  ;;  %v2980_v46 = vld [vmem:[#allocation2 + $0x4d4] sm:$0xf0]  ;;  %v2834_v41 = vld [vmem:[#allocation2 + $0x4c] sm:$0xf]  ;;  %v2679_v3 = vld [vmem:[#allocation2 + $0x508] sm:$0xf] }
 0x22d   :  { %1751 = vmatpush.bf16.msra.mxu0 %v2088_v53  ;;  %v2882_v53 = vld [vmem:[#allocation2 + $0x1cc] sm:$0xf]  ;;  %v2992_v52 = vld [vmem:[#allocation2 + $0x534] sm:$0xf0]  ;;  %v2521_v27 = vld [vmem:[#allocation2 + $0x3d8] sm:$0xf0] }
 0x22e   :  { %1764 = vmatpush.bf16.msra.mxu1 %v2216_v54  ;;  %v2265_v54 = vld [vmem:[#allocation2 + $0x1d8] sm:$0xf0]  ;;  %v2696_v1 = vor.u32 %v2992_v52, %v2695_v50  ;;  %v2988_v47 = vld [vmem:[#allocation2 + $0x514] sm:$0xf0]  ;;  %v2906_v50 = vld [vmem:[#allocation2 + $0x28c] sm:$0xf] }
 0x22f   :  { %1777 = vmatpush.bf16.msrb.mxu2 %v2344_v56  ;;  %v2648_v56 = vor.u32 %v2980_v46, %v2647_v45  ;;  %v2268_v2 = vor.u32 %v2882_v53, %v2265_v54  ;;  %v2830_v53 = vld [vmem:[#allocation2 + $0x2c] sm:$0xf]  ;;  %v2057_v54 = vld [vmem:[#allocation2 + $0x38] sm:$0xf0] }
 0x230   :  { %1790 = vmatpush.bf16.msra.mxu3 %v2472_v0  ;;  %v2976_v0 = vld [vmem:[#allocation2 + $0x4b4] sm:$0xf0]  ;;  %v2938_v52 = vld [vmem:[#allocation2 + $0x38c] sm:$0xf] }
 0x231   :  { %1752 = vmatpush.bf16.msra.mxu0 %v2072_v5  ;;  %v2878_v5 = vld [vmem:[#allocation2 + $0x1ac] sm:$0xf] }
 0x232   :  { %1765 = vmatpush.bf16.msra.mxu1 %v2200_v57  ;;  %v2249_v57 = vld [vmem:[#allocation2 + $0x1b8] sm:$0xf0] }
 0x233   :  { %1778 = vmatpush.bf16.msrb.mxu2 %v2328_v6  ;;  %v2632_v6 = vor.u32 %v2976_v0, %v2631_v26  ;;  %v2252_v11 = vor.u32 %v2878_v5, %v2249_v57  ;;  %v2551_v26 = vld [vmem:[#allocation2 + $0x408] sm:$0xf]  ;;  %v2956_v0 = vld [vmem:[#allocation2 + $0x414] sm:$0xf0]  ;;  %v2041_v57 = vld [vmem:[#allocation2 + $0x18] sm:$0xf0] }
 0x234   :  { %1791 = vmatpush.bf16.msra.mxu3 %v2456_v9  ;;  %v2972_v9 = vld [vmem:[#allocation2 + $0x494] sm:$0xf0] }
 0x235   :  { %1753 = vmatpush.bf16.msra.mxu0 %v2056_v15  ;;  %v2874_v15 = vld [vmem:[#allocation2 + $0x18c] sm:$0xf]  ;;  %v2616_v17 = vor.u32 %v2972_v9, %v2615_v8  ;;  %v2409_v8 = vld [vmem:[#allocation2 + $0x2f8] sm:$0xf0] }
 0x236   :  { %1766 = vmatpush.bf16.msra.mxu1 %v2184_v18  ;;  %v2744_v18 = vor.u32 %v3004_v12, %v2743_v10  ;;  %v2950_v9 = vld [vmem:[#allocation2 + $0x3ec] sm:$0xf]  ;;  %v2552_v10 = vor.u32 %v2956_v0, %v2551_v26 }
 0x237   :  { %1779 = vmatpush.bf16.msrb.mxu2 %v2312_v19  ;;  %v2108_v19 = vor.u32 %v2842_v13, %v2105_v14  ;;  %v2982_v12 = vld [vmem:[#allocation2 + $0x4ec] sm:$0xf]  ;;  %v2665_v13 = vld [vmem:[#allocation2 + $0x4f8] sm:$0xf0]  ;;  %v2680_v14 = vor.u32 %v2988_v47, %v2679_v3 }
 0x238   :  { %1792 = vmatpush.bf16.msra.mxu3 %v2440_v23  ;;  %v2236_v23 = vor.u32 %v2874_v15, %v2233_v16  ;;  %v2044_v15 = vor.u32 %v2826_v4, %v2041_v57  ;;  %v3014_v16 = vld [vmem:[#allocation2 + $0x5ec] sm:$0xf]  ;;  %v2668_v21 = vor.u32 %v2982_v12, %v2665_v13  ;;  %v2345_v3 = vld [vmem:[#allocation2 + $0x278] sm:$0xf0] }
 0x239   :  { %1754 = vmatpush.bf16.msra.mxu0 %v2040_v31  ;;  %v2728_v31 = vor.u32 %v3000_v24, %v2727_v22  ;;  %v2914_v22 = vld [vmem:[#allocation2 + $0x2cc] sm:$0xf]  ;;  %v2473_v57 = vld [vmem:[#allocation2 + $0x378] sm:$0xf0] }
 0x23a   :  { %1767 = vmatpush.bf16.msra.mxu1 %v2168_v37  ;;  %v2711_v37 = vld [vmem:[#allocation2 + $0x548] sm:$0xf]  ;;  %v2946_v24 = vld [vmem:[#allocation2 + $0x3cc] sm:$0xf]  ;;  %v2329_v13 = vld [vmem:[#allocation2 + $0x258] sm:$0xf0] }
 0x23b   :  { %1780 = vmatpush.bf16.msrb.mxu2 %v2296_v39  ;;  %v2220_v39 = vor.u32 %v2870_v28, %v2217_v29  ;;  %v2712_v45 = vor.u32 %v2996_v40, %v2711_v37  ;;  %v2978_v28 = vld [vmem:[#allocation2 + $0x4cc] sm:$0xf]  ;;  %v2649_v29 = vld [vmem:[#allocation2 + $0x4d8] sm:$0xf0] }
 0x23c   :  { %1793 = vmatpush.bf16.msra.mxu3 %v2424_v42  ;;  %1755 = vmatmul.bf16.vlgmr.msra.gmra.mxu0 %v3295_v55  ;;  %v2073_v42 = vld [vmem:[#allocation2 + $0x58] sm:$0xf0]  ;;  %v2910_v37 = vld [vmem:[#allocation2 + $0x2ac] sm:$0xf] }
 0x23d   :  { %1799 = vmatpush.bf16.msrb.mxu0 %v2664_v48  ;;  %1768 = vmatmul.bf16.vlgmr.msra.gmra.mxu1 %v3307_v63  ;;  %v2866_v48 = vld [vmem:[#allocation2 + $0x14c] sm:$0xf]  ;;  %v2076_v46 = vor.u32 %v2834_v41, %v2073_v42  ;;  %v2505_v42 = vld [vmem:[#allocation2 + $0x3b8] sm:$0xf0] }
 0x23e   :  { %1812 = vmatpush.bf16.msrb.mxu1 %v2792_v43  ;;  %1781 = vmatmul.bf16.vlgmr.msrb.gmra.mxu2 %v3299_v60  ;;  %v2201_v43 = vld [vmem:[#allocation2 + $0x158] sm:$0xf0]  ;;  %v2942_v40 = vld [vmem:[#allocation2 + $0x3ac] sm:$0xf] }
 0x23f   :  { %1825 = vmatpush.bf16.msra.mxu2 %v2156_v44  ;;  %1794 = vmatmul.bf16.vlgmr.msra.gmra.mxu3 %v3303_v61  ;;  %v2584_v44 = vor.u32 %v2964_v36, %v2583_v34  ;;  %v2204_v51 = vor.u32 %v2866_v48, %v2201_v43  ;;  %v2524_v34 = vor.u32 %v2946_v24, %v2521_v27  ;;  %v2974_v48 = vld [vmem:[#allocation2 + $0x4ac] sm:$0xf]  ;;  %v2633_v43 = vld [vmem:[#allocation2 + $0x4b8] sm:$0xf0] }
 0x240   :  { %1838 = vmatpush.bf16.msrb.mxu3 %v2284_v49  ;;  %v2960_v49 = vld [vmem:[#allocation2 + $0x434] sm:$0xf0]  ;;  %v2652_v36 = vor.u32 %v2978_v28, %v2649_v29  ;;  %v2934_v47 = vld [vmem:[#allocation2 + $0x36c] sm:$0xf]  ;;  %v2313_v29 = vld [vmem:[#allocation2 + $0x238] sm:$0xf0] }
 0x241   :  { %1800 = vmatpush.bf16.msrb.mxu0 %v2648_v56  ;;  %v2862_v56 = vld [vmem:[#allocation2 + $0x12c] sm:$0xf] }
 0x242   :  { %1813 = vmatpush.bf16.msrb.mxu1 %v2776_v59  ;;  %v2185_v59 = vld [vmem:[#allocation2 + $0x138] sm:$0xf0]  ;;  %v2898_v12 = vld [vmem:[#allocation2 + $0x24c] sm:$0xf] }
 0x243   :  { %1826 = vmatpush.bf16.msra.mxu2 %v2140_v62  ;;  %v2568_v62 = vor.u32 %v2960_v49, %v2567_v58  ;;  %v2188_v5 = vor.u32 %v2862_v56, %v2185_v59  ;;  %v2508_v58 = vor.u32 %v2942_v40, %v2505_v42  ;;  %v2636_v49 = vor.u32 %v2974_v48, %v2633_v43  ;;  %v2970_v56 = vld [vmem:[#allocation2 + $0x48c] sm:$0xf]  ;;  %v2697_v40 = vld [vmem:[#allocation2 + $0x538] sm:$0xf0] }
 0x244   :  { %1839 = vmatpush.bf16.msrb.mxu3 %v2268_v2  ;;  %v2060_v2 = vor.u32 %v2830_v53, %v2057_v54  ;;  %v2489_v54 = vld [vmem:[#allocation2 + $0x398] sm:$0xf0]  ;;  %v3002_v59 = vld [vmem:[#allocation2 + $0x58c] sm:$0xf]  ;;  %v2332_v24 = vor.u32 %v2898_v12, %v2329_v13 }
 0x245   :  { %1801 = vmatpush.bf16.msrb.mxu0 %v2632_v6  ;;  %v2858_v6 = vld [vmem:[#allocation2 + $0x10c] sm:$0xf]  ;;  %v2492_v0 = vor.u32 %v2938_v52, %v2489_v54  ;;  %v2681_v54 = vld [vmem:[#allocation2 + $0x518] sm:$0xf0] }
 0x246   :  { %1814 = vmatpush.bf16.msrb.mxu1 %v2760_v7  ;;  %v2169_v7 = vld [vmem:[#allocation2 + $0x118] sm:$0xf0]  ;;  %v2894_v28 = vld [vmem:[#allocation2 + $0x22c] sm:$0xf] }
 0x247   :  { %1827 = vmatpush.bf16.msra.mxu2 %v2124_v38  ;;  %v2918_v38 = vld [vmem:[#allocation2 + $0x2ec] sm:$0xf] }
 0x248   :  { %1840 = vmatpush.bf16.msrb.mxu3 %v2252_v11  ;;  %v2537_v11 = vld [vmem:[#allocation2 + $0x3f8] sm:$0xf0]  ;;  %v2890_v43 = vld [vmem:[#allocation2 + $0x20c] sm:$0xf] }
 0x249   :  { %1802 = vmatpush.bf16.msrb.mxu0 %v2616_v17  ;;  %v2793_v17 = vld [vmem:[#allocation2 + $0x5f8] sm:$0xf0]  ;;  %v2540_v20 = vor.u32 %v2950_v9, %v2537_v11 }
 0x24a   :  { %1815 = vmatpush.bf16.msrb.mxu1 %v2744_v18  ;;  %v2172_v18 = vor.u32 %v2858_v6, %v2169_v7  ;;  %v2796_v25 = vor.u32 %v3014_v16, %v2793_v17  ;;  %v2966_v6 = vld [vmem:[#allocation2 + $0x46c] sm:$0xf]  ;;  %v2601_v7 = vld [vmem:[#allocation2 + $0x478] sm:$0xf0] }
 0x24b   :  { %1828 = vmatpush.bf16.msra.mxu2 %v2108_v19  ;;  %v2412_v19 = vor.u32 %v2918_v38, %v2409_v8  ;;  %v2998_v38 = vld [vmem:[#allocation2 + $0x56c] sm:$0xf]  ;;  %v2729_v8 = vld [vmem:[#allocation2 + $0x578] sm:$0xf0]  ;;  %v2604_v11 = vor.u32 %v2966_v6, %v2601_v7 }
 0x24c   :  { %1841 = vmatpush.bf16.msrb.mxu3 %v2236_v23  ;;  %v2393_v23 = vld [vmem:[#allocation2 + $0x2d8] sm:$0xf0]  ;;  %v2962_v17 = vld [vmem:[#allocation2 + $0x44c] sm:$0xf] }
 0x24d   :  { %1803 = vmatpush.bf16.msrb.mxu0 %v2600_v30  ;;  %v3010_v30 = vld [vmem:[#allocation2 + $0x5cc] sm:$0xf]  ;;  %v2457_v16 = vld [vmem:[#allocation2 + $0x358] sm:$0xf0] }
 0x24e   :  { %1816 = vmatpush.bf16.msrb.mxu1 %v2728_v31  ;;  %v2777_v31 = vld [vmem:[#allocation2 + $0x5d8] sm:$0xf0] }
 0x24f   :  { %1829 = vmatpush.bf16.msra.mxu2 %v2092_v33  ;;  %v2396_v33 = vor.u32 %v2914_v22, %v2393_v23  ;;  %v2780_v41 = vor.u32 %v3010_v30, %v2777_v31  ;;  %v2713_v22 = vld [vmem:[#allocation2 + $0x558] sm:$0xf0]  ;;  %v2926_v30 = vld [vmem:[#allocation2 + $0x32c] sm:$0xf] }
 0x250   :  { %1842 = vmatpush.bf16.msrb.mxu3 %v2220_v39  ;;  %v2377_v39 = vld [vmem:[#allocation2 + $0x2b8] sm:$0xf0] }
 0x251   :  { %1804 = vmatpush.bf16.msrb.mxu0 %v2584_v44  ;;  %v3006_v44 = vld [vmem:[#allocation2 + $0x5ac] sm:$0xf] }
 0x252   :  { %1817 = vmatpush.bf16.msrb.mxu1 %v2712_v45  ;;  %v2761_v45 = vld [vmem:[#allocation2 + $0x5b8] sm:$0xf0] }
 0x253   :  { %1830 = vmatpush.bf16.msra.mxu2 %v2076_v46  ;;  %v2380_v46 = vor.u32 %v2910_v37, %v2377_v39  ;;  %v2764_v53 = vor.u32 %v3006_v44, %v2761_v45  ;;  %v2569_v37 = vld [vmem:[#allocation2 + $0x438] sm:$0xf0]  ;;  %v2990_v39 = vld [vmem:[#allocation2 + $0x52c] sm:$0xf] }
 0x254   :  { %1843 = vmatpush.bf16.msrb.mxu3 %v2204_v51  ;;  %v2361_v51 = vld [vmem:[#allocation2 + $0x298] sm:$0xf0]  ;;  %v2922_v45 = vld [vmem:[#allocation2 + $0x30c] sm:$0xf] }
 0x255   :  { %1805 = vmatpush.bf16.msrb.mxu0 %v2568_v62  ;;  %v2364_v26 = vor.u32 %v2906_v50, %v2361_v51  ;;  %v2297_v44 = vld [vmem:[#allocation2 + $0x218] sm:$0xf0] }
 0x256   :  { %1818 = vmatpush.bf16.msrb.mxu1 %v2696_v1  ;;  %v2553_v50 = vld [vmem:[#allocation2 + $0x418] sm:$0xf0] }
 0x257   :  { %1831 = vmatpush.bf16.msra.mxu2 %v2060_v2  ;;  %v2902_v2 = vld [vmem:[#allocation2 + $0x26c] sm:$0xf] }
 0x258   :  { %1844 = vmatpush.bf16.msrb.mxu3 %v2188_v5  ;;  %v2348_v9 = vor.u32 %v2902_v2, %v2345_v3 }
 0x259   :  { %1806 = vmatpush.bf16.msrb.mxu0 %v2552_v10  ;;  %v3337_v62 = vpop.f32.mrf.mxu0  ;;  %v2476_v10 = vor.u32 %v2934_v47, %v2473_v57 }
 0x25a   :  { %1819 = vmatpush.bf16.msrb.mxu1 %v2680_v14  ;;  %v3339_v4 = vpop.f32.mrf.mxu1  ;;  %v2930_v14 = vld [vmem:[#allocation2 + $0x34c] sm:$0xf] }
 0x25b   :  { %1832 = vmatpush.bf16.msra.mxu2 %v2044_v15  ;;  %v2732_v15 = vor.u32 %v2998_v38, %v2729_v8 }
 0x25c   :  { %1845 = vmatpush.bf16.msrb.mxu3 %v2172_v18  ;;  %1807 = vmatmul.bf16.vlgmr.msrb.gmra.mxu0 %v3315_v32  ;;  %v2585_v18 = vld [vmem:[#allocation2 + $0x458] sm:$0xf0] }
 0x25d   :  { %1851 = vmatpush.bf16.msra.mxu0 %v2412_v19  ;;  %1820 = vmatmul.bf16.vlgmr.msrb.gmra.mxu1 %v3319_v35  ;;  %v2588_v27 = vor.u32 %v2962_v17, %v2585_v18 }
 0x25e   :  { %1864 = vmatpush.bf16.msra.mxu1 %v2540_v20  ;;  %1833 = vmatmul.bf16.vlgmr.msra.gmra.mxu2 %v3295_v55  ;;  %v2617_v55 = vld [vmem:[#allocation2 + $0x498] sm:$0xf0] }
 0x25f   :  { %1877 = vmatpush.bf16.msrb.mxu2 %v2668_v21  ;;  %1846 = vmatmul.bf16.vlgmr.msrb.gmra.mxu3 %v3307_v63  ;;  %v2745_v63 = vld [vmem:[#allocation2 + $0x598] sm:$0xf0]  ;;  %v2620_v1 = vor.u32 %v2970_v56, %v2617_v55  ;;  %v2994_v21 = vld [vmem:[#allocation2 + $0x54c] sm:$0xf]  ;;  %v2300_v56 = vor.u32 %v2890_v43, %v2297_v44 }
 0x260   :  { %1890 = vmatpush.bf16.msra.mxu3 %v2796_v25  ;;  %v2748_v5 = vor.u32 %v3002_v59, %v2745_v63  ;;  %v2460_v25 = vor.u32 %v2930_v14, %v2457_v16 }
 0x261   :  { %1852 = vmatpush.bf16.msra.mxu0 %v2396_v33  ;;  %v1626_v19 = vpop.f32.mrf.mxu2  ;;  %v1602_v23 = vpop.f32.mrf.mxu0  ;;  %v2716_v33 = vor.u32 %v2994_v21, %v2713_v22 }
 0x262   :  { %1865 = vmatpush.bf16.msra.mxu1 %v2524_v34  ;;  %v1639_v20 = vpop.f32.mrf.mxu3  ;;  %v1615_v31 = vpop.f32.mrf.mxu1  ;;  %v2441_v34 = vld [vmem:[#allocation2 + $0x338] sm:$0xf0] }
 0x263   :  { %1878 = vmatpush.bf16.msrb.mxu2 %v2652_v36  ;;  %v2958_v36 = vld [vmem:[#allocation2 + $0x42c] sm:$0xf]  ;;  %v2444_v42 = vor.u32 %v2926_v30, %v2441_v34 }
 0x264   :  { %1891 = vmatpush.bf16.msra.mxu3 %v2780_v41  ;;  %v2316_v41 = vor.u32 %v2894_v28, %v2313_v29  ;;  %v2572_v48 = vor.u32 %v2958_v36, %v2569_v37 }
 0x265   :  { %1853 = vmatpush.bf16.msra.mxu0 %v2380_v46  ;;  %v2700_v46 = vor.u32 %v2990_v39, %v2697_v40 }
 0x266   :  { %1866 = vmatpush.bf16.msra.mxu1 %v2508_v58  ;;  %v2425_v58 = vld [vmem:[#allocation2 + $0x318] sm:$0xf0] }
 0x267   :  { %1879 = vmatpush.bf16.msrb.mxu2 %v2636_v49  ;;  %v2954_v49 = vld [vmem:[#allocation2 + $0x40c] sm:$0xf]  ;;  %v2428_v55 = vor.u32 %v2922_v45, %v2425_v58 }
 0x268   :  { %1892 = vmatpush.bf16.msra.mxu3 %v2764_v53  ;;  %v2986_v53 = vld [vmem:[#allocation2 + $0x50c] sm:$0xf]  ;;  %v2556_v59 = vor.u32 %v2954_v49, %v2553_v50 }
 0x269   :  { %1854 = vmatpush.bf16.msra.mxu0 %v2364_v26  ;;  %v1628_v51 = vpop.f32.mrf.mxu2  ;;  %v2684_v63 = vor.u32 %v2986_v53, %v2681_v54  ;;  %v1614_v26 = vadd.f32 %v3339_v4, %v3337_v62 }
 0x26a   :  { %1867 = vmatpush.bf16.msra.mxu1 %v2492_v0  ;;  %v1641_v52 = vpop.f32.mrf.mxu3 }
 0x26b   :  { %1880 = vmatpush.bf16.msrb.mxu2 %v2620_v1  ;;  %v1627_v0 = vadd.f32 %v1626_v19, %v1614_v26 }
 0x26c   :  { %1893 = vmatpush.bf16.msra.mxu3 %v2748_v5 }
 0x26d   :  { %1855 = vmatpush.bf16.msra.mxu0 %v2348_v9  ;;  %v1640_v1 = vadd.f32 %v1639_v20, %v1627_v0 }
 0x26e   :  { %1868 = vmatpush.bf16.msra.mxu1 %v2476_v10 }
 0x26f   :  { %1881 = vmatpush.bf16.msrb.mxu2 %v2604_v11 }
 0x270   :  { %1894 = vmatpush.bf16.msra.mxu3 %v2732_v15 }
 0x271   :  { %1856 = vmatpush.bf16.msra.mxu0 %v2332_v24 }
 0x272   :  { %1869 = vmatpush.bf16.msra.mxu1 %v2460_v25 }
 0x273   :  { %1882 = vmatpush.bf16.msrb.mxu2 %v2588_v27 }
 0x274   :  { %1895 = vmatpush.bf16.msra.mxu3 %v2716_v33 }
 0x275   :  { %1857 = vmatpush.bf16.msra.mxu0 %v2316_v41 }
 0x276   :  { %1870 = vmatpush.bf16.msra.mxu1 %v2444_v42 }
 0x277   :  { %1883 = vmatpush.bf16.msrb.mxu2 %v2572_v48 }
 0x278   :  { %1896 = vmatpush.bf16.msra.mxu3 %v2700_v46 }
 0x279   :  { %1858 = vmatpush.bf16.msra.mxu0 %v2300_v56  ;;  %v1652_v2 = vpop.f32.mrf.mxu0 }
 0x27a   :  { %1871 = vmatpush.bf16.msra.mxu1 %v2428_v55  ;;  %v1653_v3 = vadd.f32 %v1652_v2, %v1640_v1  ;;  %v1665_v47 = vpop.f32.mrf.mxu1 }
 0x27b   :  { %1884 = vmatpush.bf16.msrb.mxu2 %v2556_v59 }
 0x27c   :  { %1897 = vmatpush.bf16.msra.mxu3 %v2684_v63  ;;  %1859 = vmatmul.bf16.vlgmr.msra.gmra.mxu0 %v3299_v60  ;;  %v1666_v5 = vadd.f32 %v1665_v47, %v1653_v3 }
 0x27d   :  { %1872 = vmatmul.bf16.vlgmr.msra.gmra.mxu1 %v3303_v61 }
 0x27e   :  { %1885 = vmatmul.bf16.vlgmr.msrb.gmra.mxu2 %v3315_v32  ;;  %1903 = vst [vmem:[%s3364_s6] sm:$0x3f] %v1666_v5 }
 0x27f   :  { %1898 = vmatmul.bf16.vlgmr.msra.gmra.mxu3 %v3319_v35 }
 0x281   :  { %v1678_v62 = vpop.f32.mrf.mxu2  ;;  %v1654_v57 = vpop.f32.mrf.mxu0 }
 0x282   :  { %v1691_v4 = vpop.f32.mrf.mxu3  ;;  %v1667_v6 = vpop.f32.mrf.mxu1 }
 0x283   :  { %v1692_v61 = vadd.f32 %v1691_v4, %v1678_v62 }
 0x289   :  { %v1680_v60 = vpop.f32.mrf.mxu2 }
 0x28a   :  { %v1693_v7 = vpop.f32.mrf.mxu3 }
 0x299   :  { %v1704_v38 = vpop.f32.mrf.mxu0 }
 0x29a   :  { %v1705_v32 = vadd.f32 %v1704_v38, %v1692_v61  ;;  %v1717_v8 = vpop.f32.mrf.mxu1 }
 0x29c   :  { %v1718_v35 = vadd.f32 %v1717_v8, %v1705_v32 }
 0x2a1   :  { %v1730_v9 = vpop.f32.mrf.mxu2  ;;  %v1706_v13 = vpop.f32.mrf.mxu0 }
 0x2a2   :  { %v1731_v10 = vadd.f32 %v1730_v9, %v1718_v35  ;;  %v1743_v11 = vpop.f32.mrf.mxu3  ;;  %v1719_v14 = vpop.f32.mrf.mxu1 }
 0x2a4   :  { %v1744_v12 = vadd.f32 %v1743_v11, %v1731_v10 }
 0x2a6   :  { %1904 = vst [vmem:[%s3364_s6 + $0x8] sm:$0x3f] %v1744_v12 }
 0x2a9   :  { %v1732_v15 = vpop.f32.mrf.mxu2 }
 0x2aa   :  { %v1745_v16 = vpop.f32.mrf.mxu3 }
 0x2b9   :  { %v1756_v17 = vpop.f32.mrf.mxu0 }
 0x2ba   :  { %v1769_v18 = vpop.f32.mrf.mxu1 }
 0x2bb   :  { %v1770_v25 = vadd.f32 %v1769_v18, %v1756_v17 }
 0x2c1   :  { %v1782_v19 = vpop.f32.mrf.mxu2  ;;  %v1758_v21 = vpop.f32.mrf.mxu0 }
 0x2c2   :  { %v1795_v20 = vpop.f32.mrf.mxu3  ;;  %v1771_v22 = vpop.f32.mrf.mxu1  ;;  %v1783_v27 = vadd.f32 %v1782_v19, %v1770_v25 }
 0x2c4   :  { %v1796_v28 = vadd.f32 %v1795_v20, %v1783_v27 }
 0x2c9   :  { %v1784_v23 = vpop.f32.mrf.mxu2 }
 0x2ca   :  { %v1797_v24 = vpop.f32.mrf.mxu3 }
 0x2d9   :  { %v1808_v29 = vpop.f32.mrf.mxu0 }
 0x2da   :  { %v1809_v30 = vadd.f32 %v1808_v29, %v1796_v28  ;;  %v1821_v31 = vpop.f32.mrf.mxu1 }
 0x2dc   :  { %v1822_v33 = vadd.f32 %v1821_v31, %v1809_v30 }
 0x2de   :  { %1905 = vst [vmem:[%s3364_s6 + $0x10] sm:$0x3f] %v1822_v33 }
 0x2e1   :  { %v1834_v34 = vpop.f32.mrf.mxu2  ;;  %v1810_v37 = vpop.f32.mrf.mxu0 }
 0x2e2   :  { %v1847_v36 = vpop.f32.mrf.mxu3  ;;  %v1823_v39 = vpop.f32.mrf.mxu1 }
 0x2e3   :  { %v1848_v42 = vadd.f32 %v1847_v36, %v1834_v34 }
 0x2e9   :  { %v1836_v40 = vpop.f32.mrf.mxu2 }
 0x2ea   :  { %v1849_v41 = vpop.f32.mrf.mxu3 }
 0x2f9   :  { %v1860_v48 = vpop.f32.mrf.mxu0 }
 0x2fa   :  { %v1873_v43 = vpop.f32.mrf.mxu1  ;;  %v1861_v44 = vadd.f32 %v1860_v48, %v1848_v42 }
 0x2fc   :  { %v1874_v45 = vadd.f32 %v1873_v43, %v1861_v44 }
 0x301   :  { %v1886_v46 = vpop.f32.mrf.mxu2  ;;  %v1862_v50 = vpop.f32.mrf.mxu0 }
 0x302   :  { %v1887_v58 = vadd.f32 %v1886_v46, %v1874_v45  ;;  %v1899_v49 = vpop.f32.mrf.mxu3  ;;  %v1875_v51 = vpop.f32.mrf.mxu1 }
 0x304   :  { %v1900_v52 = vadd.f32 %v1899_v49, %v1887_v58 }
 0x306   :  { %1906 = vst [vmem:[%s3364_s6 + $0x18] sm:$0x3f] %v1900_v52 }
 0x309   :  { %v1888_v53 = vpop.f32.mrf.mxu2 }
 0x30a   :  { %v1901_v54 = vpop.f32.mrf.mxu3 }
 0x30b   :  { %1911 = vsyncmov [#allocation3] }
 0x30e   :  { %s1912_s1 = vpop.sfrf %1911 }
 0x30f   :  { %p2797_p0 = scmp.ne.s32.totalorder %s1912_s1, 0 }
 0x311   :  { %1916 = shalt.err (%p2797_p0)  }

</bundles_post_ra>
